<compile_context>
chip_gen: v6e
topology: v6e:2x2x1
jax: 0.10.0
libtpu: 0.0.40
codegen_flags: <defaults>
</compile_context>

<pallas_src>
import functools

import jax
import jax.numpy as jnp
from jax import lax
from jax.experimental import pallas as pl
from jax.experimental.pallas import tpu as pltpu

LN_EPS = 1e-5
OUT_W = 128  # lane-dense output slab: q1 -> col 0, q2 -> col 1


def _round_up(x, m):
    return ((x + m - 1) // m) * m


def _cdiv(a, b):
    return (a + b - 1) // b


def _critic_kernel(*refs, feature_dim, repr_dim, mask_k, split_heads):
    if split_heads:
        (obs_ref, act_ref, wt_ref, w1h_ref, w1a_ref,
         w2a_ref, w2b_ref, w3a_ref, w3b_ref, bias_ref, out_ref, acc_ref) = refs
    else:
        (obs_ref, act_ref, wt_ref, w1h_ref, w1a_ref,
         w2_ref, w3_ref, bias_ref, out_ref, acc_ref) = refs

    k = pl.program_id(1)
    cdt = wt_ref.dtype                       # matmul-input dtype (bf16 or f32)

    # ---- trunk partial product, accumulated over K (repr_dim) tiles -------
    @pl.when(k == 0)
    def _():
        acc_ref[...] = jnp.zeros_like(acc_ref)

    obs = obs_ref[...]
    if mask_k:
        # The last K tile runs past repr_dim; out-of-bounds lanes are
        # unspecified, so zero them before feeding the MXU.
        col = lax.broadcasted_iota(jnp.int32, obs.shape, 1) + k * obs.shape[1]
        obs = jnp.where(col < repr_dim, obs, jnp.zeros_like(obs))
    acc_ref[...] += jnp.dot(obs.astype(cdt), wt_ref[...],
                            preferred_element_type=jnp.float32)

    # ---- LayerNorm -> tanh -> fused Q1||Q2 heads on the last K tile -------
    @pl.when(k == pl.num_programs(1) - 1)
    def _():
        f_pad = acc_ref.shape[1]
        h = acc_ref[...] + bias_ref[0:1, :f_pad]
        inv_f = jnp.float32(1.0 / feature_dim)
        mu = jnp.sum(h, axis=-1, keepdims=True) * inv_f
        d = h - mu
        # Padded trunk columns are exactly zero, so each contributes mu^2 to
        # the centered sum of squares; remove that to recover the exact
        # (biased) variance over the real feature_dim columns.
        ss = jnp.sum(d * d, axis=-1, keepdims=True)
        ss = ss - jnp.float32(f_pad - feature_dim) * (mu * mu)
        h = d * lax.rsqrt(ss * inv_f + LN_EPS)
        h = h * bias_ref[1:2, :f_pad] + bias_ref[2:3, :f_pad]   # padded cols 0
        h = jnp.tanh(h)

        # layer 1, fused heads: concat([h, action]) done as two matmuls.
        h2 = w1h_ref.shape[1]
        x = (jnp.dot(h.astype(cdt), w1h_ref[...],
                     preferred_element_type=jnp.float32)
             + jnp.dot(act_ref[...].astype(cdt), w1a_ref[...],
                       preferred_element_type=jnp.float32)
             + bias_ref[3:4, :h2])
        x = jnp.maximum(x, 0.0)

        if split_heads:
            # De-fused layers 2/3: two dense [H,H] matmuls instead of one
            # [2H,2H] block-diagonal (half the MXU FLOPs / w2 bytes).
            hd = w2a_ref.shape[0]
            y1 = jnp.dot(x[:, :hd].astype(cdt), w2a_ref[...],
                         preferred_element_type=jnp.float32) + bias_ref[4:5, :hd]
            y2 = jnp.dot(x[:, hd:2 * hd].astype(cdt), w2b_ref[...],
                         preferred_element_type=jnp.float32) + bias_ref[4:5, hd:2 * hd]
            y1 = jnp.maximum(y1, 0.0)
            y2 = jnp.maximum(y2, 0.0)
            q = (jnp.dot(y1.astype(cdt), w3a_ref[...],
                         preferred_element_type=jnp.float32)
                 + jnp.dot(y2.astype(cdt), w3b_ref[...],
                           preferred_element_type=jnp.float32))
        else:
            y = jnp.dot(x.astype(cdt), w2_ref[...],
                        preferred_element_type=jnp.float32)
            y = jnp.maximum(y + bias_ref[4:5, :h2], 0.0)
            q = jnp.dot(y.astype(cdt), w3_ref[...],
                        preferred_element_type=jnp.float32)

        out_ref[...] = (q + bias_ref[5:6, :OUT_W]).astype(out_ref.dtype)


def init_critic_params(key, repr_dim, action_dim, feature_dim, hidden_dim):
    """Deterministic synthetic init (PyTorch weight shapes: [out, in])."""
    ks = jax.random.split(key, 12)
    f32 = jnp.float32

    def lin(k, out_f, in_f):
        kw, kb = jax.random.split(k)
        scale = 1.0 / jnp.sqrt(jnp.asarray(in_f, f32))
        w = jax.random.normal(kw, (out_f, in_f), f32) * scale
        b = jax.random.normal(kb, (out_f,), f32) * 0.01
        return w, b

    p = {}
    p["trunk_w"], p["trunk_b"] = lin(ks[0], feature_dim, repr_dim)
    p["ln_g"] = jnp.ones((feature_dim,), f32)
    p["ln_b"] = jnp.zeros((feature_dim,), f32)
    in1 = feature_dim + action_dim
    for name, k0, k1, k2 in (("q1", ks[1], ks[2], ks[3]),
                             ("q2", ks[4], ks[5], ks[6])):
        p[f"{name}_w1"], p[f"{name}_b1"] = lin(k0, hidden_dim, in1)
        p[f"{name}_w2"], p[f"{name}_b2"] = lin(k1, hidden_dim, hidden_dim)
        p[f"{name}_w3"], p[f"{name}_b3"] = lin(k2, 1, hidden_dim)
    return p


def critic_forward(obs, action, params, *, compute_dtype=jnp.bfloat16,
                   tile_b=256, k_tile=2048):
    """obs: [B, repr_dim], action: [B, A]  ->  (q1 [B,1], q2 [B,1])

    compute_dtype: matmul-input dtype (bf16 default; f32 accumulation and
    f32 LayerNorm/tanh/relu always).  tile_b: batch rows per grid step
    (raise to 512 on v6e if VMEM allows).  k_tile: repr_dim chunk per step.
    """
    f32 = jnp.float32
    cdt = jnp.dtype(compute_dtype)
    B, repr_dim = obs.shape
    A = action.shape[1]
    F = params["trunk_w"].shape[0]               # feature_dim
    H = params["q1_w2"].shape[0]                 # hidden_dim
    F_pad = _round_up(F, 128)
    split_heads = (H % 128 == 0)                 # de-fused layer-2/3 path
    H2_pad = 2 * H if split_heads else _round_up(2 * H, 128)
    PADW = max(F_pad, H2_pad, OUT_W)

    # ---- batch tiling: aim for >=2 grid steps (v7x megacore) --------------
    sub = 8 if cdt.itemsize >= 4 else 16
    if B > tile_b:
        TB = _round_up(tile_b, sub)
    else:
        TB = _round_up(max(_cdiv(B, 2), 1), sub)
    B_pad = _round_up(B, TB)

    # ---- trunk K (repr_dim) tiling -----------------------------------------
    k_tile = _round_up(k_tile, 128)
    if repr_dim <= k_tile:
        TK, nk, K_pad = repr_dim, 1, repr_dim
    else:
        TK = k_tile
        nk = _cdiv(repr_dim, TK)
        K_pad = nk * TK
    mask_k = K_pad > repr_dim

    # obs / action stay in their stored dtype (no wrapper cast pass over the
    # biggest tensor); pad batch rows only when B is ragged w.r.t. the tile.
    if B_pad != B:
        obs_in = jnp.pad(obs, ((0, B_pad - B), (0, 0)))
        act_in = jnp.pad(action, ((0, B_pad - B), (0, 0)))
    else:
        obs_in, act_in = obs, action

    # ---- pack / pad weights (pre-transposed to (in, out)) ------------------
    wt = jnp.zeros((K_pad, F_pad), f32).at[:repr_dim, :F].set(params["trunk_w"].T)
    w1h = jnp.zeros((F_pad, H2_pad), f32)
    w1a = jnp.zeros((A, H2_pad), f32)
    bias = jnp.zeros((8, PADW), f32)
    bias = bias.at[0, :F].set(params["trunk_b"])
    bias = bias.at[1, :F].set(params["ln_g"])
    bias = bias.at[2, :F].set(params["ln_b"])
    for hi, name in enumerate(("q1", "q2")):
        c0, c1 = hi * H, (hi + 1) * H
        w1t = params[f"{name}_w1"].T                          # [F + A, H]
        w1h = w1h.at[:F, c0:c1].set(w1t[:F])
        w1a = w1a.at[:, c0:c1].set(w1t[F:])
        bias = bias.at[3, c0:c1].set(params[f"{name}_b1"])
        bias = bias.at[4, c0:c1].set(params[f"{name}_b2"])
        bias = bias.at[5, hi].set(params[f"{name}_b3"][0])
    if split_heads:
        head_ws = (
            params["q1_w2"].T.astype(cdt),                                   # [H, H]
            params["q2_w2"].T.astype(cdt),                                   # [H, H]
            jnp.zeros((H, OUT_W), f32).at[:, 0].set(params["q1_w3"][0]).astype(cdt),
            jnp.zeros((H, OUT_W), f32).at[:, 1].set(params["q2_w3"][0]).astype(cdt),
        )
    else:
        w2 = jnp.zeros((H2_pad, H2_pad), f32)
        w3 = jnp.zeros((H2_pad, OUT_W), f32)
        for hi, name in enumerate(("q1", "q2")):
            c0, c1 = hi * H, (hi + 1) * H
            w2 = w2.at[c0:c1, c0:c1].set(params[f"{name}_w2"].T)
            w3 = w3.at[c0:c1, hi].set(params[f"{name}_w3"][0])
        head_ws = (w2.astype(cdt), w3.astype(cdt))
    wt = wt.astype(cdt)
    w1h = w1h.astype(cdt)
    w1a = w1a.astype(cdt)

    # ---- VMEM budget derived from the actual footprint (+25% headroom) ----
    resident = (w1h.size + w1a.size + sum(w.size for w in head_ws)) * cdt.itemsize
    resident += bias.size * 4
    streamed = (2 * TB * TK * obs_in.dtype.itemsize          # obs (double buffer)
                + 2 * TK * F_pad * cdt.itemsize              # trunk weight tile
                + 2 * TB * A * act_in.dtype.itemsize         # action
                + 2 * TB * OUT_W * 4)                        # output slab
    needed = 2 * resident + streamed + TB * F_pad * 4        # 2x: worst-case buffering
    vmem_limit = int(min(max(needed * 5 // 4, 8 << 20), 64 << 20))

    kernel = functools.partial(_critic_kernel, feature_dim=F, repr_dim=repr_dim,
                               mask_k=mask_k, split_heads=split_heads)
    grid = (B_pad // TB, nk)

    def run(single_buffer_weights):
        if single_buffer_weights:
            def const_spec(a):
                return pl.BlockSpec(a.shape, lambda i, k: (0, 0),
                                    pipeline_mode=pl.Buffered(1))
        else:
            def const_spec(a):
                return pl.BlockSpec(a.shape, lambda i, k: (0, 0))
        in_specs = [
            # obs stream: raise to pl.Buffered(3) here if profiling shows
            # exposed DMA latency on the obs HBM stream.
            pl.BlockSpec((TB, TK), lambda i, k: (i, k)),      # obs (streamed)
            pl.BlockSpec((TB, A), lambda i, k: (i, 0)),       # action
            pl.BlockSpec((TK, F_pad), lambda i, k: (k, 0)),   # trunk weight tile
            const_spec(w1h), const_spec(w1a),
            *[const_spec(w) for w in head_ws],
            const_spec(bias),
        ]
        return pl.pallas_call(
            kernel,
            out_shape=jax.ShapeDtypeStruct((B_pad, OUT_W), jnp.float32),
            grid=grid,
            in_specs=in_specs,
            out_specs=pl.BlockSpec((TB, OUT_W), lambda i, k: (i, 0)),
            scratch_shapes=[pltpu.VMEM((TB, F_pad), jnp.float32)],
            compiler_params=pltpu.CompilerParams(
                dimension_semantics=("parallel", "arbitrary"),
                vmem_limit_bytes=vmem_limit,
            ),
        )(obs_in, act_in, wt, w1h, w1a, *head_ws, bias)

    try:
        out = run(True)       # single-buffer the grid-resident weights
    except Exception:         # pl.Buffered(1) unsupported -> default buffering
        out = run(False)

    q = out[:B, :2]
    return q[:, 0:1], q[:, 1:2]


def _reference(obs, action, params):
    """Pure-JAX reference mirroring the PyTorch module."""
    h = obs @ params["trunk_w"].T + params["trunk_b"]
    mu = jnp.mean(h, -1, keepdims=True)
    var = jnp.mean((h - mu) ** 2, -1, keepdims=True)
    h = (h - mu) / jnp.sqrt(var + LN_EPS) * params["ln_g"] + params["ln_b"]
    h = jnp.tanh(h)
    ha = jnp.concatenate([h, action], axis=-1)

    def head(name):
        x = jnp.maximum(ha @ params[f"{name}_w1"].T + params[f"{name}_b1"], 0.0)
        x = jnp.maximum(x @ params[f"{name}_w2"].T + params[f"{name}_b2"], 0.0)
        return x @ params[f"{name}_w3"].T + params[f"{name}_b3"]

    return head("q1"), head("q2")


if __name__ == "__main__":
    # --- Test 1: tiny fused-head path (H < 128), exact f32 check -----------
    B, R, A, F, H = 8, 64, 4, 32, 32
    k_obs, k_act, k_par = jax.random.split(jax.random.PRNGKey(0), 3)
    obs = jax.random.normal(k_obs, (B, R), jnp.float32)
    act = jax.random.uniform(k_act, (B, A), jnp.float32, -1.0, 1.0)
    params = init_critic_params(k_par, R, A, F, H)
    q1, q2 = critic_forward(obs, act, params, compute_dtype=jnp.float32)
    jax.block_until_ready((q1, q2))
    r1, r2 = _reference(obs, act, params)
    assert q1.shape == (B, 1) and q2.shape == (B, 1)
    assert jnp.allclose(q1, r1, atol=1e-4, rtol=1e-4)
    assert jnp.allclose(q2, r2, atol=1e-4, rtol=1e-4)

    # --- Test 2: K-tiled trunk (ragged last tile) + de-fused heads, f32 ----
    B2, R2, A2, F2, H2 = 40, 200, 6, 64, 128
    k_obs2, k_act2, k_par2 = jax.random.split(jax.random.PRNGKey(1), 3)
    obs2 = jax.random.normal(k_obs2, (B2, R2), jnp.float32)
    act2 = jax.random.uniform(k_act2, (B2, A2), jnp.float32, -1.0, 1.0)
    params2 = init_critic_params(k_par2, R2, A2, F2, H2)
    q1b, q2b = critic_forward(obs2, act2, params2, compute_dtype=jnp.float32,
                              tile_b=16, k_tile=128)
    jax.block_until_ready((q1b, q2b))
    r1b, r2b = _reference(obs2, act2, params2)
    assert q1b.shape == (B2, 1) and q2b.shape == (B2, 1)
    assert jnp.allclose(q1b, r1b, atol=1e-4, rtol=1e-4)
    assert jnp.allclose(q2b, r2b, atol=1e-4, rtol=1e-4)

    # --- Test 3: default bf16 matmul inputs (f32 accumulation / LN) --------
    q1c, q2c = critic_forward(obs2, act2, params2)
    jax.block_until_ready((q1c, q2c))
    assert jnp.allclose(q1c, r1b, atol=1e-1, rtol=1e-1)
    assert jnp.allclose(q2c, r2b, atol=1e-1, rtol=1e-1)

    print("KERNEL_OK")
</pallas_src>

<mosaic_0001>
module attributes {stable_mosaic.version = 11 : i64} {
  func.func @_critic_kernel(%arg0: i32, %arg1: i32, %arg2: memref<8x64xf32, #tpu.memory_space<vmem>>, %arg3: memref<8x4xf32, #tpu.memory_space<vmem>>, %arg4: memref<64x128xf32, #tpu.memory_space<vmem>>, %arg5: memref<128x128xf32, #tpu.memory_space<vmem>>, %arg6: memref<4x128xf32, #tpu.memory_space<vmem>>, %arg7: memref<128x128xf32, #tpu.memory_space<vmem>>, %arg8: memref<128x128xf32, #tpu.memory_space<vmem>>, %arg9: memref<8x128xf32, #tpu.memory_space<vmem>>, %arg10: memref<8x128xf32, #tpu.memory_space<vmem>>, %arg11: memref<8x128xf32, #tpu.memory_space<vmem>>) attributes {dimension_semantics = [#tpu.dimension_semantics<parallel>, #tpu.dimension_semantics<arbitrary>], iteration_bounds = array<i64: 1, 1>, scalar_prefetch = 0 : i64, scratch_operands = 1 : i64, tpu.core_type = #tpu.core_type<tc>, window_params = [{transform_indices = @transform_0, window_bounds = array<i64: 8, 64>}, {transform_indices = @transform_1, window_bounds = array<i64: 8, 4>}, {transform_indices = @transform_2, window_bounds = array<i64: 64, 128>}, {pipeline_mode = #tpu.pipeline_mode<synchronous>, transform_indices = @transform_3, window_bounds = array<i64: 128, 128>}, {pipeline_mode = #tpu.pipeline_mode<synchronous>, transform_indices = @transform_4, window_bounds = array<i64: 4, 128>}, {pipeline_mode = #tpu.pipeline_mode<synchronous>, transform_indices = @transform_5, window_bounds = array<i64: 128, 128>}, {pipeline_mode = #tpu.pipeline_mode<synchronous>, transform_indices = @transform_6, window_bounds = array<i64: 128, 128>}, {pipeline_mode = #tpu.pipeline_mode<synchronous>, transform_indices = @transform_7, window_bounds = array<i64: 8, 128>}, {transform_indices = @transform_8, window_bounds = array<i64: 8, 128>}]} {
    %c0_i32 = arith.constant 0 : i32
    %0 = arith.cmpi eq, %arg1, %c0_i32 : i32
    %1 = arith.extui %0 : i1 to i32
    %c0_i32_0 = arith.constant 0 : i32
    %2 = arith.cmpi ne, %1, %c0_i32_0 : i32
    scf.if %2 {
      %cst_10 = arith.constant 0.000000e+00 : f32
      %12 = vector.broadcast %cst_10 : f32 to vector<8x128xf32>
      %c0_11 = arith.constant 0 : index
      %c0_12 = arith.constant 0 : index
      %13 = vector.load %arg11[%c0_11, %c0_12] : memref<8x128xf32, #tpu.memory_space<vmem>>, vector<8x128xf32>
      tpu.vector_store %arg11[%c0_11, %c0_12], %12 {strides = array<i32>} : memref<8x128xf32, #tpu.memory_space<vmem>>, vector<8x128xf32>,
    } else {
    }
    %c0 = arith.constant 0 : index
    %c0_1 = arith.constant 0 : index
    %3 = vector.load %arg2[%c0, %c0_1] : memref<8x64xf32, #tpu.memory_space<vmem>>, vector<8x64xf32>
    %c0_2 = arith.constant 0 : index
    %c0_3 = arith.constant 0 : index
    %4 = vector.load %arg11[%c0_2, %c0_3] : memref<8x128xf32, #tpu.memory_space<vmem>>, vector<8x128xf32>
    %c0_4 = arith.constant 0 : index
    %c0_5 = arith.constant 0 : index
    %5 = vector.load %arg4[%c0_4, %c0_5] : memref<64x128xf32, #tpu.memory_space<vmem>>, vector<64x128xf32>
    %cst = arith.constant dense<0.000000e+00> : vector<8x128xf32>
    %6 = tpu.matmul %3, %5, %cst {dimension_numbers = #tpu.dot_dimension_numbers<[1], [0], [0], [1], [0, 0, 1, 1], [], []>} : vector<8x64xf32>, vector<64x128xf32>, vector<8x128xf32> -> vector<8x128xf32>
    %7 = arith.addf %4, %6 : vector<8x128xf32>
    %c0_6 = arith.constant 0 : index
    %c0_7 = arith.constant 0 : index
    %8 = vector.load %arg11[%c0_6, %c0_7] : memref<8x128xf32, #tpu.memory_space<vmem>>, vector<8x128xf32>
    tpu.vector_store %arg11[%c0_6, %c0_7], %7 {strides = array<i32>} : memref<8x128xf32, #tpu.memory_space<vmem>>, vector<8x128xf32>,
    %c0_i32_8 = arith.constant 0 : i32
    %9 = arith.cmpi eq, %arg1, %c0_i32_8 : i32
    %10 = arith.extui %9 : i1 to i32
    %c0_i32_9 = arith.constant 0 : i32
    %11 = arith.cmpi ne, %10, %c0_i32_9 : i32
    scf.if %11 {
      %c0_10 = arith.constant 0 : index
      %c0_11 = arith.constant 0 : index
      %12 = vector.load %arg11[%c0_10, %c0_11] : memref<8x128xf32, #tpu.memory_space<vmem>>, vector<8x128xf32>
      %c0_12 = arith.constant 0 : index
      %c0_13 = arith.constant 0 : index
      %13 = vector.load %arg9[%c0_12, %c0_13] : memref<8x128xf32, #tpu.memory_space<vmem>>, vector<1x128xf32>
      %14 = vector.broadcast %13 : vector<1x128xf32> to vector<8x128xf32>
      %15 = arith.addf %12, %14 : vector<8x128xf32>
      %cst_14 = arith.constant dense<0.000000e+00> : vector<8xf32>
      %16 = vector.multi_reduction <add>, %15, %cst_14 [1] : vector<8x128xf32> to vector<8xf32>
      %17 = vector.shape_cast %16 : vector<8xf32> to vector<8x1xf32>
      %cst_15 = arith.constant 3.125000e-02 : f32
      %18 = vector.broadcast %cst_15 : f32 to vector<8x1xf32>
      %19 = arith.mulf %17, %18 : vector<8x1xf32>
      %20 = vector.broadcast %19 : vector<8x1xf32> to vector<8x128xf32>
      %21 = arith.subf %15, %20 : vector<8x128xf32>
      %22 = arith.mulf %21, %21 : vector<8x128xf32>
      %cst_16 = arith.constant dense<0.000000e+00> : vector<8xf32>
      %23 = vector.multi_reduction <add>, %22, %cst_16 [1] : vector<8x128xf32> to vector<8xf32>
      %24 = vector.shape_cast %23 : vector<8xf32> to vector<8x1xf32>
      %25 = arith.mulf %19, %19 : vector<8x1xf32>
      %cst_17 = arith.constant 9.600000e+01 : f32
      %26 = vector.broadcast %cst_17 : f32 to vector<8x1xf32>
      %27 = arith.mulf %26, %25 : vector<8x1xf32>
      %28 = arith.subf %24, %27 : vector<8x1xf32>
      %cst_18 = arith.constant 3.125000e-02 : f32
      %29 = vector.broadcast %cst_18 : f32 to vector<8x1xf32>
      %30 = arith.mulf %28, %29 : vector<8x1xf32>
      %cst_19 = arith.constant 9.99999974E-6 : f32
      %31 = vector.broadcast %cst_19 : f32 to vector<8x1xf32>
      %32 = arith.addf %30, %31 : vector<8x1xf32>
      %33 = math.rsqrt %32 : vector<8x1xf32>
      %34 = vector.broadcast %33 : vector<8x1xf32> to vector<8x128xf32>
      %35 = arith.mulf %21, %34 : vector<8x128xf32>
      %c1 = arith.constant 1 : index
      %c0_20 = arith.constant 0 : index
      %36 = vector.load %arg9[%c1, %c0_20] : memref<8x128xf32, #tpu.memory_space<vmem>>, vector<1x128xf32>
      %37 = vector.broadcast %36 : vector<1x128xf32> to vector<8x128xf32>
      %38 = arith.mulf %35, %37 : vector<8x128xf32>
      %c2 = arith.constant 2 : index
      %c0_21 = arith.constant 0 : index
      %39 = vector.load %arg9[%c2, %c0_21] : memref<8x128xf32, #tpu.memory_space<vmem>>, vector<1x128xf32>
      %40 = vector.broadcast %39 : vector<1x128xf32> to vector<8x128xf32>
      %41 = arith.addf %38, %40 : vector<8x128xf32>
      %42 = math.tanh %41 : vector<8x128xf32>
      %c0_22 = arith.constant 0 : index
      %c0_23 = arith.constant 0 : index
      %43 = vector.load %arg5[%c0_22, %c0_23] : memref<128x128xf32, #tpu.memory_space<vmem>>, vector<128x128xf32>
      %cst_24 = arith.constant dense<0.000000e+00> : vector<8x128xf32>
      %44 = tpu.matmul %42, %43, %cst_24 {dimension_numbers = #tpu.dot_dimension_numbers<[1], [0], [0], [1], [0, 0, 1, 1], [], []>} : vector<8x128xf32>, vector<128x128xf32>, vector<8x128xf32> -> vector<8x128xf32>
      %c0_25 = arith.constant 0 : index
      %c0_26 = arith.constant 0 : index
      %45 = vector.load %arg3[%c0_25, %c0_26] : memref<8x4xf32, #tpu.memory_space<vmem>>, vector<8x4xf32>
      %c0_27 = arith.constant 0 : index
      %c0_28 = arith.constant 0 : index
      %46 = vector.load %arg6[%c0_27, %c0_28] : memref<4x128xf32, #tpu.memory_space<vmem>>, vector<4x128xf32>
      %cst_29 = arith.constant dense<0.000000e+00> : vector<8x128xf32>
      %47 = tpu.matmul %45, %46, %cst_29 {dimension_numbers = #tpu.dot_dimension_numbers<[1], [0], [0], [1], [0, 0, 1, 1], [], []>} : vector<8x4xf32>, vector<4x128xf32>, vector<8x128xf32> -> vector<8x128xf32>
      %48 = arith.addf %44, %47 : vector<8x128xf32>
      %c3 = arith.constant 3 : index
      %c0_30 = arith.constant 0 : index
      %49 = vector.load %arg9[%c3, %c0_30] : memref<8x128xf32, #tpu.memory_space<vmem>>, vector<1x128xf32>
      %50 = vector.broadcast %49 : vector<1x128xf32> to vector<8x128xf32>
      %51 = arith.addf %48, %50 : vector<8x128xf32>
      %cst_31 = arith.constant 0.000000e+00 : f32
      %52 = vector.broadcast %cst_31 : f32 to vector<8x128xf32>
      %53 = arith.maximumf %51, %52 : vector<8x128xf32>
      %c0_32 = arith.constant 0 : index
      %c0_33 = arith.constant 0 : index
      %54 = vector.load %arg7[%c0_32, %c0_33] : memref<128x128xf32, #tpu.memory_space<vmem>>, vector<128x128xf32>
      %cst_34 = arith.constant dense<0.000000e+00> : vector<8x128xf32>
      %55 = tpu.matmul %53, %54, %cst_34 {dimension_numbers = #tpu.dot_dimension_numbers<[1], [0], [0], [1], [0, 0, 1, 1], [], []>} : vector<8x128xf32>, vector<128x128xf32>, vector<8x128xf32> -> vector<8x128xf32>
      %c4 = arith.constant 4 : index
      %c0_35 = arith.constant 0 : index
      %56 = vector.load %arg9[%c4, %c0_35] : memref<8x128xf32, #tpu.memory_space<vmem>>, vector<1x128xf32>
      %57 = vector.broadcast %56 : vector<1x128xf32> to vector<8x128xf32>
      %58 = arith.addf %55, %57 : vector<8x128xf32>
      %cst_36 = arith.constant 0.000000e+00 : f32
      %59 = vector.broadcast %cst_36 : f32 to vector<8x128xf32>
      %60 = arith.maximumf %58, %59 : vector<8x128xf32>
      %c0_37 = arith.constant 0 : index
      %c0_38 = arith.constant 0 : index
      %61 = vector.load %arg8[%c0_37, %c0_38] : memref<128x128xf32, #tpu.memory_space<vmem>>, vector<128x128xf32>
      %cst_39 = arith.constant dense<0.000000e+00> : vector<8x128xf32>
      %62 = tpu.matmul %60, %61, %cst_39 {dimension_numbers = #tpu.dot_dimension_numbers<[1], [0], [0], [1], [0, 0, 1, 1], [], []>} : vector<8x128xf32>, vector<128x128xf32>, vector<8x128xf32> -> vector<8x128xf32>
      %c5 = arith.constant 5 : index
      %c0_40 = arith.constant 0 : index
      %63 = vector.load %arg9[%c5, %c0_40] : memref<8x128xf32, #tpu.memory_space<vmem>>, vector<1x128xf32>
      %64 = vector.broadcast %63 : vector<1x128xf32> to vector<8x128xf32>
      %65 = arith.addf %62, %64 : vector<8x128xf32>
      %c0_41 = arith.constant 0 : index
      %c0_42 = arith.constant 0 : index
      %66 = vector.load %arg10[%c0_41, %c0_42] : memref<8x128xf32, #tpu.memory_space<vmem>>, vector<8x128xf32>
      tpu.vector_store %arg10[%c0_41, %c0_42], %65 {strides = array<i32>} : memref<8x128xf32, #tpu.memory_space<vmem>>, vector<8x128xf32>,
    } else {
    }
    return
  }
  func.func @transform_0(%arg0: i32, %arg1: i32) -> (i32, i32) {
    %c0_i32 = arith.constant 0 : i32
    return %arg0, %arg1 : i32, i32
  }
  func.func @transform_1(%arg0: i32, %arg1: i32) -> (i32, i32) {
    %c0_i32 = arith.constant 0 : i32
    %c0_i32_0 = arith.constant 0 : i32
    return %arg0, %c0_i32 : i32, i32
  }
  func.func @transform_2(%arg0: i32, %arg1: i32) -> (i32, i32) {
    %c0_i32 = arith.constant 0 : i32
    %c0_i32_0 = arith.constant 0 : i32
    return %arg1, %c0_i32 : i32, i32
  }
  func.func @transform_3(%arg0: i32, %arg1: i32) -> (i32, i32) {
    %c0_i32 = arith.constant 0 : i32
    %c0_i32_0 = arith.constant 0 : i32
    %c0_i32_1 = arith.constant 0 : i32
    return %c0_i32, %c0_i32_0 : i32, i32
  }
  func.func @transform_4(%arg0: i32, %arg1: i32) -> (i32, i32) {
    %c0_i32 = arith.constant 0 : i32
    %c0_i32_0 = arith.constant 0 : i32
    %c0_i32_1 = arith.constant 0 : i32
    return %c0_i32, %c0_i32_0 : i32, i32
  }
  func.func @transform_5(%arg0: i32, %arg1: i32) -> (i32, i32) {
    %c0_i32 = arith.constant 0 : i32
    %c0_i32_0 = arith.constant 0 : i32
    %c0_i32_1 = arith.constant 0 : i32
    return %c0_i32, %c0_i32_0 : i32, i32
  }
  func.func @transform_6(%arg0: i32, %arg1: i32) -> (i32, i32) {
    %c0_i32 = arith.constant 0 : i32
    %c0_i32_0 = arith.constant 0 : i32
    %c0_i32_1 = arith.constant 0 : i32
    return %c0_i32, %c0_i32_0 : i32, i32
  }
  func.func @transform_7(%arg0: i32, %arg1: i32) -> (i32, i32) {
    %c0_i32 = arith.constant 0 : i32
    %c0_i32_0 = arith.constant 0 : i32
    %c0_i32_1 = arith.constant 0 : i32
    return %c0_i32, %c0_i32_0 : i32, i32
  }
  func.func @transform_8(%arg0: i32, %arg1: i32) -> (i32, i32) {
    %c0_i32 = arith.constant 0 : i32
    %c0_i32_0 = arith.constant 0 : i32
    return %arg0, %c0_i32 : i32, i32
  }
}

module attributes {stable_mosaic.version = 11 : i64} {
  func.func @_critic_kernel(%arg0: i32, %arg1: i32, %arg2: memref<8x64xf32, #tpu.memory_space<vmem>>, %arg3: memref<8x4xf32, #tpu.memory_space<vmem>>, %arg4: memref<64x128xf32, #tpu.memory_space<vmem>>, %arg5: memref<128x128xf32, #tpu.memory_space<vmem>>, %arg6: memref<4x128xf32, #tpu.memory_space<vmem>>, %arg7: memref<128x128xf32, #tpu.memory_space<vmem>>, %arg8: memref<128x128xf32, #tpu.memory_space<vmem>>, %arg9: memref<8x128xf32, #tpu.memory_space<vmem>>, %arg10: memref<8x128xf32, #tpu.memory_space<vmem>>, %arg11: memref<8x128xf32, #tpu.memory_space<vmem>>) attributes {dimension_semantics = [#tpu.dimension_semantics<parallel>, #tpu.dimension_semantics<arbitrary>], iteration_bounds = array<i64: 1, 1>, scalar_prefetch = 0 : i64, scratch_operands = 1 : i64, tpu.core_type = #tpu.core_type<tc>, window_params = [{transform_indices = @transform_0, window_bounds = array<i64: 8, 64>}, {transform_indices = @transform_1, window_bounds = array<i64: 8, 4>}, {transform_indices = @transform_2, window_bounds = array<i64: 64, 128>}, {pipeline_mode = #tpu.pipeline_mode<synchronous>, transform_indices = @transform_3, window_bounds = array<i64: 128, 128>}, {pipeline_mode = #tpu.pipeline_mode<synchronous>, transform_indices = @transform_4, window_bounds = array<i64: 4, 128>}, {pipeline_mode = #tpu.pipeline_mode<synchronous>, transform_indices = @transform_5, window_bounds = array<i64: 128, 128>}, {pipeline_mode = #tpu.pipeline_mode<synchronous>, transform_indices = @transform_6, window_bounds = array<i64: 128, 128>}, {pipeline_mode = #tpu.pipeline_mode<synchronous>, transform_indices = @transform_7, window_bounds = array<i64: 8, 128>}, {transform_indices = @transform_8, window_bounds = array<i64: 8, 128>}]} {
    %c0_i32 = arith.constant 0 : i32
    %0 = arith.cmpi eq, %arg1, %c0_i32 : i32
    %1 = arith.extui %0 : i1 to i32
    %c0_i32_0 = arith.constant 0 : i32
    %2 = arith.cmpi ne, %1, %c0_i32_0 : i32
    scf.if %2 {
      %cst_10 = arith.constant 0.000000e+00 : f32
      %12 = vector.broadcast %cst_10 : f32 to vector<8x128xf32>
      %c0_11 = arith.constant 0 : index
      %c0_12 = arith.constant 0 : index
      %13 = vector.load %arg11[%c0_11, %c0_12] : memref<8x128xf32, #tpu.memory_space<vmem>>, vector<8x128xf32>
      tpu.vector_store %arg11[%c0_11, %c0_12], %12 {strides = array<i32>} : memref<8x128xf32, #tpu.memory_space<vmem>>, vector<8x128xf32>,
    } else {
    }
    %c0 = arith.constant 0 : index
    %c0_1 = arith.constant 0 : index
    %3 = vector.load %arg2[%c0, %c0_1] : memref<8x64xf32, #tpu.memory_space<vmem>>, vector<8x64xf32>
    %c0_2 = arith.constant 0 : index
    %c0_3 = arith.constant 0 : index
    %4 = vector.load %arg11[%c0_2, %c0_3] : memref<8x128xf32, #tpu.memory_space<vmem>>, vector<8x128xf32>
    %c0_4 = arith.constant 0 : index
    %c0_5 = arith.constant 0 : index
    %5 = vector.load %arg4[%c0_4, %c0_5] : memref<64x128xf32, #tpu.memory_space<vmem>>, vector<64x128xf32>
    %cst = arith.constant dense<0.000000e+00> : vector<8x128xf32>
    %6 = tpu.matmul %3, %5, %cst {dimension_numbers = #tpu.dot_dimension_numbers<[1], [0], [0], [1], [0, 0, 1, 1], [], []>} : vector<8x64xf32>, vector<64x128xf32>, vector<8x128xf32> -> vector<8x128xf32>
    %7 = arith.addf %4, %6 : vector<8x128xf32>
    %c0_6 = arith.constant 0 : index
    %c0_7 = arith.constant 0 : index
    %8 = vector.load %arg11[%c0_6, %c0_7] : memref<8x128xf32, #tpu.memory_space<vmem>>, vector<8x128xf32>
    tpu.vector_store %arg11[%c0_6, %c0_7], %7 {strides = array<i32>} : memref<8x128xf32, #tpu.memory_space<vmem>>, vector<8x128xf32>,
    %c0_i32_8 = arith.constant 0 : i32
    %9 = arith.cmpi eq, %arg1, %c0_i32_8 : i32
    %10 = arith.extui %9 : i1 to i32
    %c0_i32_9 = arith.constant 0 : i32
    %11 = arith.cmpi ne, %10, %c0_i32_9 : i32
    scf.if %11 {
      %c0_10 = arith.constant 0 : index
      %c0_11 = arith.constant 0 : index
      %12 = vector.load %arg11[%c0_10, %c0_11] : memref<8x128xf32, #tpu.memory_space<vmem>>, vector<8x128xf32>
      %c0_12 = arith.constant 0 : index
      %c0_13 = arith.constant 0 : index
      %13 = vector.load %arg9[%c0_12, %c0_13] : memref<8x128xf32, #tpu.memory_space<vmem>>, vector<1x128xf32>
      %14 = vector.broadcast %13 : vector<1x128xf32> to vector<8x128xf32>
      %15 = arith.addf %12, %14 : vector<8x128xf32>
      %cst_14 = arith.constant dense<0.000000e+00> : vector<8xf32>
      %16 = vector.multi_reduction <add>, %15, %cst_14 [1] : vector<8x128xf32> to vector<8xf32>
      %17 = vector.shape_cast %16 : vector<8xf32> to vector<8x1xf32>
      %cst_15 = arith.constant 3.125000e-02 : f32
      %18 = vector.broadcast %cst_15 : f32 to vector<8x1xf32>
      %19 = arith.mulf %17, %18 : vector<8x1xf32>
      %20 = vector.broadcast %19 : vector<8x1xf32> to vector<8x128xf32>
      %21 = arith.subf %15, %20 : vector<8x128xf32>
      %22 = arith.mulf %21, %21 : vector<8x128xf32>
      %cst_16 = arith.constant dense<0.000000e+00> : vector<8xf32>
      %23 = vector.multi_reduction <add>, %22, %cst_16 [1] : vector<8x128xf32> to vector<8xf32>
      %24 = vector.shape_cast %23 : vector<8xf32> to vector<8x1xf32>
      %25 = arith.mulf %19, %19 : vector<8x1xf32>
      %cst_17 = arith.constant 9.600000e+01 : f32
      %26 = vector.broadcast %cst_17 : f32 to vector<8x1xf32>
      %27 = arith.mulf %26, %25 : vector<8x1xf32>
      %28 = arith.subf %24, %27 : vector<8x1xf32>
      %cst_18 = arith.constant 3.125000e-02 : f32
      %29 = vector.broadcast %cst_18 : f32 to vector<8x1xf32>
      %30 = arith.mulf %28, %29 : vector<8x1xf32>
      %cst_19 = arith.constant 9.99999974E-6 : f32
      %31 = vector.broadcast %cst_19 : f32 to vector<8x1xf32>
      %32 = arith.addf %30, %31 : vector<8x1xf32>
      %33 = math.rsqrt %32 : vector<8x1xf32>
      %34 = vector.broadcast %33 : vector<8x1xf32> to vector<8x128xf32>
      %35 = arith.mulf %21, %34 : vector<8x128xf32>
      %c1 = arith.constant 1 : index
      %c0_20 = arith.constant 0 : index
      %36 = vector.load %arg9[%c1, %c0_20] : memref<8x128xf32, #tpu.memory_space<vmem>>, vector<1x128xf32>
      %37 = vector.broadcast %36 : vector<1x128xf32> to vector<8x128xf32>
      %38 = arith.mulf %35, %37 : vector<8x128xf32>
      %c2 = arith.constant 2 : index
      %c0_21 = arith.constant 0 : index
      %39 = vector.load %arg9[%c2, %c0_21] : memref<8x128xf32, #tpu.memory_space<vmem>>, vector<1x128xf32>
      %40 = vector.broadcast %39 : vector<1x128xf32> to vector<8x128xf32>
      %41 = arith.addf %38, %40 : vector<8x128xf32>
      %42 = math.tanh %41 : vector<8x128xf32>
      %c0_22 = arith.constant 0 : index
      %c0_23 = arith.constant 0 : index
      %43 = vector.load %arg5[%c0_22, %c0_23] : memref<128x128xf32, #tpu.memory_space<vmem>>, vector<128x128xf32>
      %cst_24 = arith.constant dense<0.000000e+00> : vector<8x128xf32>
      %44 = tpu.matmul %42, %43, %cst_24 {dimension_numbers = #tpu.dot_dimension_numbers<[1], [0], [0], [1], [0, 0, 1, 1], [], []>} : vector<8x128xf32>, vector<128x128xf32>, vector<8x128xf32> -> vector<8x128xf32>
      %c0_25 = arith.constant 0 : index
      %c0_26 = arith.constant 0 : index
      %45 = vector.load %arg3[%c0_25, %c0_26] : memref<8x4xf32, #tpu.memory_space<vmem>>, vector<8x4xf32>
      %c0_27 = arith.constant 0 : index
      %c0_28 = arith.constant 0 : index
      %46 = vector.load %arg6[%c0_27, %c0_28] : memref<4x128xf32, #tpu.memory_space<vmem>>, vector<4x128xf32>
      %cst_29 = arith.constant dense<0.000000e+00> : vector<8x128xf32>
      %47 = tpu.matmul %45, %46, %cst_29 {dimension_numbers = #tpu.dot_dimension_numbers<[1], [0], [0], [1], [0, 0, 1, 1], [], []>} : vector<8x4xf32>, vector<4x128xf32>, vector<8x128xf32> -> vector<8x128xf32>
      %48 = arith.addf %44, %47 : vector<8x128xf32>
      %c3 = arith.constant 3 : index
      %c0_30 = arith.constant 0 : index
      %49 = vector.load %arg9[%c3, %c0_30] : memref<8x128xf32, #tpu.memory_space<vmem>>, vector<1x128xf32>
      %50 = vector.broadcast %49 : vector<1x128xf32> to vector<8x128xf32>
      %51 = arith.addf %48, %50 : vector<8x128xf32>
      %cst_31 = arith.constant 0.000000e+00 : f32
      %52 = vector.broadcast %cst_31 : f32 to vector<8x128xf32>
      %53 = arith.maximumf %51, %52 : vector<8x128xf32>
      %c0_32 = arith.constant 0 : index
      %c0_33 = arith.constant 0 : index
      %54 = vector.load %arg7[%c0_32, %c0_33] : memref<128x128xf32, #tpu.memory_space<vmem>>, vector<128x128xf32>
      %cst_34 = arith.constant dense<0.000000e+00> : vector<8x128xf32>
      %55 = tpu.matmul %53, %54, %cst_34 {dimension_numbers = #tpu.dot_dimension_numbers<[1], [0], [0], [1], [0, 0, 1, 1], [], []>} : vector<8x128xf32>, vector<128x128xf32>, vector<8x128xf32> -> vector<8x128xf32>
      %c4 = arith.constant 4 : index
      %c0_35 = arith.constant 0 : index
      %56 = vector.load %arg9[%c4, %c0_35] : memref<8x128xf32, #tpu.memory_space<vmem>>, vector<1x128xf32>
      %57 = vector.broadcast %56 : vector<1x128xf32> to vector<8x128xf32>
      %58 = arith.addf %55, %57 : vector<8x128xf32>
      %cst_36 = arith.constant 0.000000e+00 : f32
      %59 = vector.broadcast %cst_36 : f32 to vector<8x128xf32>
      %60 = arith.maximumf %58, %59 : vector<8x128xf32>
      %c0_37 = arith.constant 0 : index
      %c0_38 = arith.constant 0 : index
      %61 = vector.load %arg8[%c0_37, %c0_38] : memref<128x128xf32, #tpu.memory_space<vmem>>, vector<128x128xf32>
      %cst_39 = arith.constant dense<0.000000e+00> : vector<8x128xf32>
      %62 = tpu.matmul %60, %61, %cst_39 {dimension_numbers = #tpu.dot_dimension_numbers<[1], [0], [0], [1], [0, 0, 1, 1], [], []>} : vector<8x128xf32>, vector<128x128xf32>, vector<8x128xf32> -> vector<8x128xf32>
      %c5 = arith.constant 5 : index
      %c0_40 = arith.constant 0 : index
      %63 = vector.load %arg9[%c5, %c0_40] : memref<8x128xf32, #tpu.memory_space<vmem>>, vector<1x128xf32>
      %64 = vector.broadcast %63 : vector<1x128xf32> to vector<8x128xf32>
      %65 = arith.addf %62, %64 : vector<8x128xf32>
      %c0_41 = arith.constant 0 : index
      %c0_42 = arith.constant 0 : index
      %66 = vector.load %arg10[%c0_41, %c0_42] : memref<8x128xf32, #tpu.memory_space<vmem>>, vector<8x128xf32>
      tpu.vector_store %arg10[%c0_41, %c0_42], %65 {strides = array<i32>} : memref<8x128xf32, #tpu.memory_space<vmem>>, vector<8x128xf32>,
    } else {
    }
    return
  }
  func.func @transform_0(%arg0: i32, %arg1: i32) -> (i32, i32) {
    %c0_i32 = arith.constant 0 : i32
    return %arg0, %arg1 : i32, i32
  }
  func.func @transform_1(%arg0: i32, %arg1: i32) -> (i32, i32) {
    %c0_i32 = arith.constant 0 : i32
    %c0_i32_0 = arith.constant 0 : i32
    return %arg0, %c0_i32 : i32, i32
  }
  func.func @transform_2(%arg0: i32, %arg1: i32) -> (i32, i32) {
    %c0_i32 = arith.constant 0 : i32
    %c0_i32_0 = arith.constant 0 : i32
    return %arg1, %c0_i32 : i32, i32
  }
  func.func @transform_3(%arg0: i32, %arg1: i32) -> (i32, i32) {
    %c0_i32 = arith.constant 0 : i32
    %c0_i32_0 = arith.constant 0 : i32
    %c0_i32_1 = arith.constant 0 : i32
    return %c0_i32, %c0_i32_0 : i32, i32
  }
  func.func @transform_4(%arg0: i32, %arg1: i32) -> (i32, i32) {
    %c0_i32 = arith.constant 0 : i32
    %c0_i32_0 = arith.constant 0 : i32
    %c0_i32_1 = arith.constant 0 : i32
    return %c0_i32, %c0_i32_0 : i32, i32
  }
  func.func @transform_5(%arg0: i32, %arg1: i32) -> (i32, i32) {
    %c0_i32 = arith.constant 0 : i32
    %c0_i32_0 = arith.constant 0 : i32
    %c0_i32_1 = arith.constant 0 : i32
    return %c0_i32, %c0_i32_0 : i32, i32
  }
  func.func @transform_6(%arg0: i32, %arg1: i32) -> (i32, i32) {
    %c0_i32 = arith.constant 0 : i32
    %c0_i32_0 = arith.constant 0 : i32
    %c0_i32_1 = arith.constant 0 : i32
    return %c0_i32, %c0_i32_0 : i32, i32
  }
  func.func @transform_7(%arg0: i32, %arg1: i32) -> (i32, i32) {
    %c0_i32 = arith.constant 0 : i32
    %c0_i32_0 = arith.constant 0 : i32
    %c0_i32_1 = arith.constant 0 : i32
    return %c0_i32, %c0_i32_0 : i32, i32
  }
  func.func @transform_8(%arg0: i32, %arg1: i32) -> (i32, i32) {
    %c0_i32 = arith.constant 0 : i32
    %c0_i32_0 = arith.constant 0 : i32
    return %arg0, %c0_i32 : i32, i32
  }
}

</mosaic_0001>

<bundles_post_ra>
// kernel: tpu_custom_call.1
= control target key start
LH: loop header
LB: loop body
LE: loop exit
PB: predicated region body
PF: predicated region fallthrough
CT: control target
= control target key end

     0   :  { %13 = vsyncpa [#allocation4], 0  ;;  %s1126_s0 = inlined_call_operand.vmem [shape: f32[8,64], index: 0, kind: input, shape index: {}]   ;;  %s1127_s1 = inlined_call_operand.vmem [shape: f32[8,4], index: 1, kind: input, shape index: {}]   ;;  %s1128_s2 = inlined_call_operand.hbm [shape: f32[64,128], index: 2, kind: input, shape index: {}]   ;;  %s1129_s3 = inlined_call_operand.hbm [shape: f32[128,128], index: 3, kind: input, shape index: {}]   ;;  %s1130_s4 = inlined_call_operand.hbm [shape: f32[4,128], index: 4, kind: input, shape index: {}]   ;;  %s1131_s5 = inlined_call_operand.hbm [shape: f32[128,128], index: 5, kind: input, shape index: {}]   ;;  %s1132_s6 = inlined_call_operand.hbm [shape: f32[128,128], index: 6, kind: input, shape index: {}]   ;;  %s1133_s7 = inlined_call_operand.vmem [shape: f32[8,128], index: 7, kind: input, shape index: {}]   ;;  %s1134_s8 = inlined_call_operand.hbm [shape: f32[8,128], index: 8, kind: output, shape index: {}]  }
   0x1   :  { %14 = vsyncpa [#allocation7], 0 }
   0x2   :  { %15 = vsyncpa [#allocation10], 0 }
   0x3   :  { %16 = vsyncpa [#allocation5], 0  ;;  %s940_s27 = smov [#allocation6]   ;;  %s941_s29 = smov [#allocation9]  }
   0x4   :  { %s38_s28 = sshll.u32 %s940_s27, 4  ;;  %s60_s30 = sshll.u32 %s941_s29, 4  ;;  %s39_s28 = int_to_ptr.vmem [resolvable:$true] %s38_s28  ;;  %s61_s30 = int_to_ptr.vmem [resolvable:$true] %s60_s30 }
   0x5   :  { %s820_s9 = scalar_lea.vmem %s39_s28, 2048  ;;  %p825_p1 = scmp.lt.s32.totalorder %s39_s28, %s39_s28 }
   0x6   :  { %p821_p0 = scmp.ne.s32.totalorder %s39_s28, %s820_s9  ;;  %p826_p2 = scmp.lt.s32.totalorder %s820_s9, %s820_s9 }
   0x8   :  { %p827_p3 = por %p826_p2, %p825_p1 }
   0xa   :  { %p828_p4 = pnand %p827_p3, %p821_p0 }
   0xc   :  { %831 = shalt.err (!%p828_p4)
}
   0xd   :  { %s942_s10 = smov 128   ;;  %s943_s11 = smov 8  }
   0xe   :  { %44 = dma.hbm_to_vmem [thread:$0]  %s1129_s3, 2048, %s39_s28, [#allocation7], %s942_s10, %s942_s10, %s943_s11  }
   0xf   :  { %s840_s14 = scalar_lea.vmem %s61_s30, 2048  ;;  %p845_p6 = scmp.lt.s32.totalorder %s61_s30, %s61_s30 }
  0x10   :  { %p841_p5 = scmp.ne.s32.totalorder %s61_s30, %s840_s14  ;;  %p846_p7 = scmp.lt.s32.totalorder %s840_s14, %s840_s14 }
  0x12   :  { %p847_p8 = por %p846_p7, %p845_p6 }
  0x14   :  { %p848_p9 = pnand %p847_p8, %p841_p5 }
  0x16   :  { %851 = shalt.err (!%p848_p9)
}
  0x17   :  { %66 = dma.hbm_to_vmem [thread:$0]  %s1131_s5, 2048, %s61_s30, [#allocation10], %s942_s10, %s942_s10, %s943_s11  }
  0x18   :  { %s944_s17 = smov [#allocation3]   ;;  %s945_s19 = smov [#allocation8]  }
  0x19   :  { %s26_s18 = sshll.u32 %s944_s17, 4  ;;  %s51_s20 = sshll.u32 %s945_s19, 4  ;;  %s27_s18 = int_to_ptr.vmem [resolvable:$true] %s26_s18  ;;  %s52_s20 = int_to_ptr.vmem [resolvable:$true] %s51_s20 }
  0x1a   :  { %s860_s3 = scalar_lea.vmem %s27_s18, 1024  ;;  %p865_p11 = scmp.lt.s32.totalorder %s27_s18, %s27_s18 }
  0x1b   :  { %p861_p10 = scmp.ne.s32.totalorder %s27_s18, %s860_s3  ;;  %p866_p12 = scmp.lt.s32.totalorder %s860_s3, %s860_s3 }
  0x1d   :  { %p867_p13 = por %p866_p12, %p865_p11 }
  0x1f   :  { %p868_p0 = pnand %p867_p13, %p861_p10 }
  0x21   :  { %871 = shalt.err (!%p868_p0)
}
  0x22   :  { %32 = dma.hbm_to_vmem [thread:$0]  %s1128_s2, 1024, %s27_s18, [#allocation4], %s942_s10, %s942_s10, %s943_s11  }
  0x23   :  { %s880_s5 = scalar_lea.vmem %s52_s20, 64  ;;  %p885_p2 = scmp.lt.s32.totalorder %s52_s20, %s52_s20 }
  0x24   :  { %p881_p1 = scmp.ne.s32.totalorder %s52_s20, %s880_s5  ;;  %p886_p3 = scmp.lt.s32.totalorder %s880_s5, %s880_s5 }
  0x26   :  { %p887_p4 = por %p886_p3, %p885_p2 }
  0x28   :  { %p888_p5 = pnand %p887_p4, %p881_p1 }
  0x2a   :  { %891 = shalt.err (!%p888_p5)
}
  0x2b   :  { %54 = dma.hbm_to_vmem [thread:$0]  %s1130_s4, 64, %s52_s20, [#allocation7]  }
  0x2c   :  { %s946_s25 = smov [#allocation11]  }
  0x2d   :  { %s72_s26 = sshll.u32 %s946_s25, 4  ;;  %s73_s26 = int_to_ptr.vmem [resolvable:$true] %s72_s26 }
  0x2e   :  { %s900_s27 = scalar_lea.vmem %s73_s26, 2048  ;;  %p905_p7 = scmp.lt.s32.totalorder %s73_s26, %s73_s26 }
  0x2f   :  { %p901_p6 = scmp.ne.s32.totalorder %s73_s26, %s900_s27  ;;  %p906_p8 = scmp.lt.s32.totalorder %s900_s27, %s900_s27 }
  0x31   :  { %p907_p9 = por %p906_p8, %p905_p7 }
  0x33   :  { %p908_p10 = pnand %p907_p9, %p901_p6 }
  0x35   :  { %911 = shalt.err (!%p908_p10)
}
  0x36   :  { %78 = dma.hbm_to_vmem [thread:$0]  %s1132_s6, 2048, %s73_s26, [#allocation10], %s942_s10, %s942_s10, %s943_s11  }
  0x37   :  { %932 = dma.done.wait [#allocation4], 1024  }
  0x38   :  { %933 = vsyncadd [#allocation4], 4294966272 }
  0x39   :  { %934 = dma.done.wait [#allocation7], 2112  }
  0x3a   :  { %935 = vsyncadd [#allocation7], 4294965184 }
  0x3b   :  { %936 = dma.done.wait [#allocation10], 4096  }
  0x3c   :  { %937 = vsyncadd [#allocation10], 4294963200  ;;  %v947_v0 = vmov 0.0   ;;  %vm948_vm0 = vmmov 0   ;;  %v110_v1 = vld [vmem:[#allocation3 + $0x38] sm:$0xff]  ;;  %v109_v2 = vld [vmem:[#allocation3 + $0x30] sm:$0xff] }
  0x3d   :  { %669 = vmatprep.subr.mxu0 %v947_v0  ;;  %685 = vmatprep.mubr.msk.f32.mxu0 %vm948_vm0, %v947_v0  ;;  %v108_v3 = vld [vmem:[#allocation3 + $0x28] sm:$0xff]  ;;  %v107_v4 = vld [vmem:[#allocation3 + $0x20] sm:$0xff]  ;;  %v106_v5 = vld [vmem:[#allocation3 + $0x18] sm:$0xff]  ;;  %vm111_vm1 = vcmask 523264   ;;  %vm246_vm2 = vcmask 1043456   ;;  %vm242_vm3 = vcmask 31744  }
  0x3e   :  { %693 = vmatprep.subr.mxu1 %v947_v0  ;;  %725 = vmatprep.mubr.msk.f32.mxu1 %vm948_vm0, %v947_v0  ;;  %v105_v6 = vld [vmem:[#allocation3 + $0x10] sm:$0xff]  ;;  %v104_v7 = vld [vmem:[#allocation3 + $0x8] sm:$0xff]  ;;  %v103_v8 = vld [vmem:[#allocation3] sm:$0xff]  ;;  %s949_s19 = smov [#allocation12]  }
  0x3f   :  { %670 = vmatpush3.msra.mxu0 %v110_v1  ;;  %v101_v9 = vld [vmem:[%s1126_s0] sm:$0xff]  ;;  %v239_v18 = vld [vmem:[#allocation6 + $0x78] sm:$0xff]  ;;  %v238_v19 = vld [vmem:[#allocation6 + $0x70] sm:$0xff]  ;;  %s587_s20 = sshll.u32 %s949_s19, 4  ;;  %s588_s20 = int_to_ptr.vmem [resolvable:$true] %s587_s20 }
  0x40   :  { %671 = vmatprep.subr.mxu0 %v947_v0  ;;  %v599_v10 = vld [vmem:[%s1133_s7] ss:$0 sm:$0xff]  ;;  %694 = vmatpush3.msra.mxu1 %v239_v18  ;;  %v237_v20 = vld [vmem:[#allocation6 + $0x68] sm:$0xff]  ;;  %v235_v22 = vld [vmem:[#allocation6 + $0x58] sm:$0xff]  ;;  %s912_s3 = scalar_lea.vmem %s588_s20, 128  ;;  %p917_p12 = scmp.lt.s32.totalorder %s588_s20, %s588_s20 }
  0x41   :  { %672 = vmatpush3.msra.mxu0 %v109_v2  ;;  %695 = vmatprep.subr.mxu1 %v947_v0  ;;  %v236_v21 = vld [vmem:[#allocation6 + $0x60] sm:$0xff]  ;;  %v234_v23 = vld [vmem:[#allocation6 + $0x50] sm:$0xff]  ;;  %v233_v24 = vld [vmem:[#allocation6 + $0x48] sm:$0xff]  ;;  %p913_p11 = scmp.ne.s32.totalorder %s588_s20, %s912_s3  ;;  %p918_p13 = scmp.lt.s32.totalorder %s912_s3, %s912_s3 }
  0x42   :  { %673 = vmatprep.subr.mxu0 %v947_v0  ;;  %696 = vmatpush3.msra.mxu1 %v238_v19  ;;  %v232_v25 = vld [vmem:[#allocation6 + $0x40] sm:$0xff]  ;;  %v231_v26 = vld [vmem:[#allocation6 + $0x38] sm:$0xff]  ;;  %v230_v27 = vld [vmem:[#allocation6 + $0x30] sm:$0xff] }
  0x43   :  { %674 = vmatpush3.msra.mxu0 %v108_v3  ;;  %697 = vmatprep.subr.mxu1 %v947_v0  ;;  %v229_v28 = vld [vmem:[#allocation6 + $0x28] sm:$0xff]  ;;  %v241_v29 = vld [vmem:[#allocation8] sm:$0xf]  ;;  %v227_v32 = vld [vmem:[#allocation6 + $0x18] sm:$0xff]  ;;  %p919_p0 = por %p918_p13, %p917_p12 }
  0x44   :  { %675 = vmatprep.subr.mxu0 %v947_v0  ;;  %698 = vmatpush3.msra.mxu1 %v237_v20  ;;  %v228_v30 = vld [vmem:[#allocation6 + $0x20] sm:$0xff]  ;;  %v226_v33 = vld [vmem:[#allocation6 + $0x10] sm:$0xff]  ;;  %v225_v34 = vld [vmem:[#allocation6 + $0x8] sm:$0xff] }
  0x45   :  { %676 = vmatpush3.msra.mxu0 %v107_v4  ;;  %699 = vmatprep.subr.mxu1 %v947_v0  ;;  %v240_v31 = vld [vmem:[%s1127_s1] sm:$0xff]  ;;  %v411_v37 = vld [vmem:[#allocation9 + $0x70] sm:$0xff]  ;;  %v410_v38 = vld [vmem:[#allocation9 + $0x68] sm:$0xff]  ;;  %p920_p1 = pnand %p919_p0, %p913_p11 }
  0x46   :  { %677 = vmatprep.subr.mxu0 %v947_v0  ;;  %700 = vmatpush3.msra.mxu1 %v236_v21  ;;  %v224_v35 = vld [vmem:[#allocation6] sm:$0xff]  ;;  %v407_v41 = vld [vmem:[#allocation9 + $0x50] sm:$0xff]  ;;  %v406_v42 = vld [vmem:[#allocation9 + $0x48] sm:$0xff] }
  0x47   :  { %678 = vmatpush3.msra.mxu0 %v106_v5  ;;  %701 = vmatprep.subr.mxu1 %v947_v0  ;;  %v412_v36 = vld [vmem:[#allocation9 + $0x78] sm:$0xff]  ;;  %v409_v39 = vld [vmem:[#allocation9 + $0x60] sm:$0xff]  ;;  %v403_v45 = vld [vmem:[#allocation9 + $0x30] sm:$0xff] }
  0x48   :  { %679 = vmatprep.subr.mxu0 %v947_v0  ;;  %702 = vmatpush3.msra.mxu1 %v235_v22  ;;  %v408_v40 = vld [vmem:[#allocation9 + $0x58] sm:$0xff]  ;;  %v405_v43 = vld [vmem:[#allocation9 + $0x40] sm:$0xff]  ;;  %v402_v46 = vld [vmem:[#allocation9 + $0x28] sm:$0xff] }
  0x49   :  { %680 = vmatpush3.msra.mxu0 %v105_v6  ;;  %703 = vmatprep.subr.mxu1 %v947_v0  ;;  %v404_v44 = vld [vmem:[#allocation9 + $0x38] sm:$0xff]  ;;  %v401_v47 = vld [vmem:[#allocation9 + $0x20] sm:$0xff]  ;;  %v399_v1 = vld [vmem:[#allocation9 + $0x10] sm:$0xff] }
  0x4a   :  { %681 = vmatprep.subr.mxu0 %v947_v0  ;;  %704 = vmatpush3.msra.mxu1 %v234_v23  ;;  %v600_v55 = vld [vmem:[%s1133_s7 + $0x1] ss:$0 sm:$0xff]  ;;  %v601_v57 = vld [vmem:[%s1133_s7 + $0x2] ss:$0 sm:$0xff]  ;;  %v398_v2 = vld [vmem:[#allocation9 + $0x8] sm:$0xff] }
  0x4b   :  { %682 = vmatpush3.msra.mxu0 %v104_v7  ;;  %705 = vmatprep.subr.mxu1 %v947_v0  ;;  %v400_v63 = vld [vmem:[#allocation9 + $0x18] sm:$0xff]  ;;  %v397_v3 = vld [vmem:[#allocation9] sm:$0xff]  ;;  %v503_v5 = vld [vmem:[#allocation11 + $0x70] sm:$0xff] }
  0x4c   :  { %683 = vmatprep.subr.mxu0 %v947_v0  ;;  %706 = vmatpush3.msra.mxu1 %v233_v24  ;;  %v504_v4 = vld [vmem:[#allocation11 + $0x78] sm:$0xff]  ;;  %v502_v6 = vld [vmem:[#allocation11 + $0x68] sm:$0xff]  ;;  %v501_v7 = vld [vmem:[#allocation11 + $0x60] sm:$0xff] }
  0x4d   :  { %684 = vmatpush3.msra.mxu0 %v103_v8  ;;  %707 = vmatprep.subr.mxu1 %v947_v0  ;;  %v500_v8 = vld [vmem:[#allocation11 + $0x58] sm:$0xff]  ;;  %v491_v23 = vld [vmem:[#allocation11 + $0x10] sm:$0xff]  ;;  %v490_v24 = vld [vmem:[#allocation11 + $0x8] sm:$0xff] }
  0x4e   :  { %686 = vmatmul.mubr.msk.f32.vlgmr.msra.gmra.mxu0 %vm111_vm1, %v101_v9  ;;  %688 = vmatprep.subr.mxu0 %v947_v0  ;;  %v499_v9 = vld [vmem:[#allocation11 + $0x50] sm:$0xff]  ;;  %v604_v18 = vld [vmem:[%s1133_s7 + $0x3] ss:$0 sm:$0xff] }
  0x4f   :  { %690 = vmatprep.mubr.msk.f32.mxu0 %vm948_vm0, %v947_v0  ;;  %708 = vmatpush3.msra.mxu1 %v232_v25  ;;  %v489_v25 = vld [vmem:[#allocation11] sm:$0xff] }
  0x50   :  { %709 = vmatprep.subr.mxu1 %v947_v0  ;;  %689 = vmatpush3.msk.msra.mxu0 %vm246_vm2, %v241_v29 }
  0x51   :  { %710 = vmatpush3.msra.mxu1 %v231_v26  ;;  %728 = vmatprep.subr.mxu0 %v947_v0  ;;  %v605_v26 = vld [vmem:[%s1133_s7 + $0x4] ss:$0 sm:$0xff] }
  0x52   :  { %711 = vmatprep.subr.mxu1 %v947_v0  ;;  %691 = vmatmul.mubr.msk.f32.vlgmr.msra.gmra.mxu0 %vm242_vm3, %v240_v31  ;;  %v606_v31 = vld [vmem:[%s1133_s7 + $0x5] ss:$0 sm:$0xff] }
  0x53   :  { %712 = vmatpush3.msra.mxu1 %v230_v27  ;;  %760 = vmatprep.mubr.msk.f32.mxu0 %vm948_vm0, %v947_v0 }
  0x54   :  { %713 = vmatprep.subr.mxu1 %v947_v0  ;;  %729 = vmatpush3.msra.mxu0 %v412_v36 }
  0x55   :  { %714 = vmatpush3.msra.mxu1 %v229_v28  ;;  %730 = vmatprep.subr.mxu0 %v947_v0 }
  0x56   :  { %715 = vmatprep.subr.mxu1 %v947_v0  ;;  %731 = vmatpush3.msra.mxu0 %v411_v37 }
  0x57   :  { %716 = vmatpush3.msra.mxu1 %v228_v30  ;;  %732 = vmatprep.subr.mxu0 %v947_v0 }
  0x58   :  { %717 = vmatprep.subr.mxu1 %v947_v0  ;;  %733 = vmatpush3.msra.mxu0 %v410_v38 }
  0x59   :  { %718 = vmatpush3.msra.mxu1 %v227_v32  ;;  %734 = vmatprep.subr.mxu0 %v947_v0 }
  0x5a   :  { %719 = vmatprep.subr.mxu1 %v947_v0  ;;  %735 = vmatpush3.msra.mxu0 %v409_v39 }
  0x5b   :  { %720 = vmatpush3.msra.mxu1 %v226_v33  ;;  %736 = vmatprep.subr.mxu0 %v947_v0 }
  0x5c   :  { %721 = vmatprep.subr.mxu1 %v947_v0  ;;  %737 = vmatpush3.msra.mxu0 %v408_v40 }
  0x5d   :  { %722 = vmatpush3.msra.mxu1 %v225_v34  ;;  %738 = vmatprep.subr.mxu0 %v947_v0 }
  0x5e   :  { %723 = vmatprep.subr.mxu1 %v947_v0  ;;  %739 = vmatpush3.msra.mxu0 %v407_v41 }
  0x5f   :  { %724 = vmatpush3.msra.mxu1 %v224_v35  ;;  %740 = vmatprep.subr.mxu0 %v947_v0 }
  0x60   :  { %763 = vmatprep.subr.mxu1 %v947_v0  ;;  %741 = vmatpush3.msra.mxu0 %v406_v42 }
  0x61   :  { %742 = vmatprep.subr.mxu0 %v947_v0 }
  0x62   :  { %743 = vmatpush3.msra.mxu0 %v405_v43 }
  0x63   :  { %744 = vmatprep.subr.mxu0 %v947_v0 }
  0x64   :  { %745 = vmatpush3.msra.mxu0 %v404_v44 }
  0x65   :  { %746 = vmatprep.subr.mxu0 %v947_v0 }
  0x66   :  { %747 = vmatpush3.msra.mxu0 %v403_v45 }
  0x67   :  { %748 = vmatprep.subr.mxu0 %v947_v0 }
  0x68   :  { %749 = vmatpush3.msra.mxu0 %v402_v46 }
  0x69   :  { %750 = vmatprep.subr.mxu0 %v947_v0 }
  0x6a   :  { %751 = vmatpush3.msra.mxu0 %v401_v47 }
  0x6b   :  { %752 = vmatprep.subr.mxu0 %v947_v0 }
  0x6c   :  { %753 = vmatpush3.msra.mxu0 %v400_v63 }
  0x6d   :  { %754 = vmatprep.subr.mxu0 %v947_v0 }
  0x6e   :  { %755 = vmatpush3.msra.mxu0 %v399_v1 }
  0x6f   :  { %756 = vmatprep.subr.mxu0 %v947_v0 }
  0x70   :  { %757 = vmatpush3.msra.mxu0 %v398_v2 }
  0x71   :  { %758 = vmatprep.subr.mxu0 %v947_v0 }
  0x72   :  { %759 = vmatpush3.msra.mxu0 %v397_v3 }
 0x10e   :  { %v181_v11 = vpop.f32.mrf.mxu0 }
 0x10f   :  { %v196_v12 = vadd.f32 %v599_v10, %v181_v11  ;;  %v498_v10 = vld [vmem:[#allocation11 + $0x48] sm:$0xff]  ;;  %v497_v11 = vld [vmem:[#allocation11 + $0x40] sm:$0xff] }
 0x110   :  { %v687_v13 = vpop.f32.mrf.mxu0 }
 0x111   :  { %197 = vadd.xlane.f32.xlu0 %v196_v12  ;;  %v495_v13 = vld [vmem:[#allocation11 + $0x30] sm:$0xff] }
 0x112   :  { %v316_v61 = vpop.f32.mrf.mxu0 }
 0x114   :  { %v692_v62 = vpop.f32.mrf.mxu0 }
 0x19a   :  { %v198_v14 = vpop.xlane.xlu0 %197 }
 0x19b   :  { %v1044_v15 = vmul.f32 0.03125, %v198_v14  ;;  %v494_v14 = vld [vmem:[#allocation11 + $0x28] sm:$0xff] }
 0x19d   :  { %v1047_v16 = vsub.f32 %v196_v12, %v1044_v15  ;;  %v204_v48 = vmul.f32 %v1044_v15, %v1044_v15  ;;  %v496_v12 = vld [vmem:[#allocation11 + $0x38] sm:$0xff]  ;;  %v493_v15 = vld [vmem:[#allocation11 + $0x20] sm:$0xff] }
 0x19f   :  { %v201_v17 = vmul.f32 %v1047_v16, %v1047_v16  ;;  %v205_v49 = vmul.f32 96.0, %v204_v48 }
 0x1a1   :  { %202 = vadd.xlane.f32.xlu0 %v201_v17 }
 0x22a   :  { %v203_v50 = vpop.xlane.xlu0 %202 }
 0x22b   :  { %v206_v51 = vsub.f32 %v203_v50, %v205_v49 }
 0x22d   :  { %v207_v52 = vmul.f32 0.03125, %v206_v51 }
 0x22f   :  { %v208_v53 = vadd.f32 1e-05, %v207_v52 }
 0x231   :  { %808 = vrsqrt.f32 %v208_v53 }
 0x23e   :  { %v809_v54 = vpop.eup %808 }
 0x23f   :  { %v210_v56 = vmul.f32 %v809_v54, %v1047_v16  ;;  %v492_v16 = vld [vmem:[#allocation11 + $0x18] sm:$0xff] }
 0x241   :  { %v216_v58 = vmul.f32 %v600_v55, %v210_v56 }
 0x243   :  { %v222_v59 = vadd.f32 %v601_v57, %v216_v58 }
 0x245   :  { %810 = vtanh.f32 %v222_v59 }
 0x252   :  { %v811_v60 = vpop.eup %810 }
 0x253   :  { %726 = vmatmul.mubr.f32.vlgmr.msra.gmra.mxu1 %v811_v60 }
 0x254   :  { %795 = vmatprep.mubr.msk.f32.mxu1 %vm948_vm0, %v947_v0  ;;  %764 = vmatpush3.msra.mxu1 %v504_v4 }
 0x255   :  { %765 = vmatprep.subr.mxu1 %v947_v0 }
 0x256   :  { %766 = vmatpush3.msra.mxu1 %v503_v5 }
 0x257   :  { %767 = vmatprep.subr.mxu1 %v947_v0 }
 0x258   :  { %768 = vmatpush3.msra.mxu1 %v502_v6 }
 0x259   :  { %769 = vmatprep.subr.mxu1 %v947_v0 }
 0x25a   :  { %770 = vmatpush3.msra.mxu1 %v501_v7 }
 0x25b   :  { %771 = vmatprep.subr.mxu1 %v947_v0 }
 0x25c   :  { %772 = vmatpush3.msra.mxu1 %v500_v8 }
 0x25d   :  { %773 = vmatprep.subr.mxu1 %v947_v0 }
 0x25e   :  { %774 = vmatpush3.msra.mxu1 %v499_v9 }
 0x25f   :  { %775 = vmatprep.subr.mxu1 %v947_v0 }
 0x260   :  { %776 = vmatpush3.msra.mxu1 %v498_v10 }
 0x261   :  { %777 = vmatprep.subr.mxu1 %v947_v0 }
 0x262   :  { %778 = vmatpush3.msra.mxu1 %v497_v11 }
 0x263   :  { %779 = vmatprep.subr.mxu1 %v947_v0 }
 0x264   :  { %780 = vmatpush3.msra.mxu1 %v496_v12 }
 0x265   :  { %781 = vmatprep.subr.mxu1 %v947_v0 }
 0x266   :  { %782 = vmatpush3.msra.mxu1 %v495_v13 }
 0x267   :  { %783 = vmatprep.subr.mxu1 %v947_v0 }
 0x268   :  { %784 = vmatpush3.msra.mxu1 %v494_v14 }
 0x269   :  { %785 = vmatprep.subr.mxu1 %v947_v0 }
 0x26a   :  { %786 = vmatpush3.msra.mxu1 %v493_v15 }
 0x26b   :  { %787 = vmatprep.subr.mxu1 %v947_v0 }
 0x26c   :  { %788 = vmatpush3.msra.mxu1 %v492_v16 }
 0x26d   :  { %789 = vmatprep.subr.mxu1 %v947_v0 }
 0x26e   :  { %790 = vmatpush3.msra.mxu1 %v491_v23 }
 0x26f   :  { %791 = vmatprep.subr.mxu1 %v947_v0 }
 0x270   :  { %792 = vmatpush3.msra.mxu1 %v490_v24 }
 0x271   :  { %793 = vmatprep.subr.mxu1 %v947_v0 }
 0x272   :  { %794 = vmatpush3.msra.mxu1 %v489_v25 }
 0x313   :  { %v386_v17 = vpop.f32.mrf.mxu1 }
 0x314   :  { %v387_v19 = vadd.f32 %v386_v17, %v316_v61 }
 0x315   :  { %v727_v20 = vpop.f32.mrf.mxu1 }
 0x316   :  { %v395_v21 = vadd.f32 %v604_v18, %v387_v19 }
 0x318   :  { %v396_v22 = vmax.f32 %v395_v21, 0.0 }
 0x31a   :  { %761 = vmatmul.mubr.f32.vlgmr.msra.gmra.mxu0 %v396_v22 }
 0x3da   :  { %v484_v27 = vpop.f32.mrf.mxu0 }
 0x3db   :  { %v485_v28 = vadd.f32 %v605_v26, %v484_v27 }
 0x3dc   :  { %v762_v29 = vpop.f32.mrf.mxu0 }
 0x3dd   :  { %v488_v30 = vmax.f32 %v485_v28, 0.0 }
 0x3df   :  { %796 = vmatmul.mubr.f32.vlgmr.msra.gmra.mxu1 %v488_v30 }
 0x49f   :  { %v576_v32 = vpop.f32.mrf.mxu1 }
 0x4a0   :  { %v577_v33 = vadd.f32 %v606_v31, %v576_v32 }
 0x4a1   :  { %v797_v0 = vpop.f32.mrf.mxu1 }
 0x4a2   :  { %580 = vst [vmem:[#allocation12] sm:$0xff] %v577_v33 }
 0x4a3   :  { %923 = shalt.err (!%p920_p1)
}
 0x4a4   :  { %590 = dma.vmem_to_hbm [thread:$0]  %s588_s20, 128, %s1134_s8, [#allocation5]  }
 0x4a5   :  { %938 = dma.done.wait [#allocation5], 128  }
 0x4a6   :  { %939 = vsyncadd [#allocation5], 4294967168 }
 0x4a7   :  { %594 = vsyncpa [#allocation4], 1 }
 0x4a8   :  { %595 = vsyncpa [#allocation7], 1 }
 0x4a9   :  { %596 = vsyncpa [#allocation10], 1 }
 0x4aa   :  { %597 = vsyncpa [#allocation5], 1 }

// kernel: tpu_custom_call.1
= control target key start
LH: loop header
LB: loop body
LE: loop exit
PB: predicated region body
PF: predicated region fallthrough
CT: control target
= control target key end

     0   :  { %13 = vsyncpa [#allocation4], 0  ;;  %s1126_s0 = inlined_call_operand.vmem [shape: f32[8,64], index: 0, kind: input, shape index: {}]   ;;  %s1127_s1 = inlined_call_operand.vmem [shape: f32[8,4], index: 1, kind: input, shape index: {}]   ;;  %s1128_s2 = inlined_call_operand.hbm [shape: f32[64,128], index: 2, kind: input, shape index: {}]   ;;  %s1129_s3 = inlined_call_operand.hbm [shape: f32[128,128], index: 3, kind: input, shape index: {}]   ;;  %s1130_s4 = inlined_call_operand.hbm [shape: f32[4,128], index: 4, kind: input, shape index: {}]   ;;  %s1131_s5 = inlined_call_operand.hbm [shape: f32[128,128], index: 5, kind: input, shape index: {}]   ;;  %s1132_s6 = inlined_call_operand.hbm [shape: f32[128,128], index: 6, kind: input, shape index: {}]   ;;  %s1133_s7 = inlined_call_operand.vmem [shape: f32[8,128], index: 7, kind: input, shape index: {}]   ;;  %s1134_s8 = inlined_call_operand.hbm [shape: f32[8,128], index: 8, kind: output, shape index: {}]  }
   0x1   :  { %14 = vsyncpa [#allocation7], 0 }
   0x2   :  { %15 = vsyncpa [#allocation10], 0 }
   0x3   :  { %16 = vsyncpa [#allocation5], 0  ;;  %s940_s27 = smov [#allocation6]   ;;  %s941_s29 = smov [#allocation9]  }
   0x4   :  { %s38_s28 = sshll.u32 %s940_s27, 4  ;;  %s60_s30 = sshll.u32 %s941_s29, 4  ;;  %s39_s28 = int_to_ptr.vmem [resolvable:$true] %s38_s28  ;;  %s61_s30 = int_to_ptr.vmem [resolvable:$true] %s60_s30 }
   0x5   :  { %s820_s9 = scalar_lea.vmem %s39_s28, 2048  ;;  %p825_p1 = scmp.lt.s32.totalorder %s39_s28, %s39_s28 }
   0x6   :  { %p821_p0 = scmp.ne.s32.totalorder %s39_s28, %s820_s9  ;;  %p826_p2 = scmp.lt.s32.totalorder %s820_s9, %s820_s9 }
   0x8   :  { %p827_p3 = por %p826_p2, %p825_p1 }
   0xa   :  { %p828_p4 = pnand %p827_p3, %p821_p0 }
   0xc   :  { %831 = shalt.err (!%p828_p4)
}
   0xd   :  { %s942_s10 = smov 128   ;;  %s943_s11 = smov 8  }
   0xe   :  { %44 = dma.hbm_to_vmem [thread:$0]  %s1129_s3, 2048, %s39_s28, [#allocation7], %s942_s10, %s942_s10, %s943_s11  }
   0xf   :  { %s840_s14 = scalar_lea.vmem %s61_s30, 2048  ;;  %p845_p6 = scmp.lt.s32.totalorder %s61_s30, %s61_s30 }
  0x10   :  { %p841_p5 = scmp.ne.s32.totalorder %s61_s30, %s840_s14  ;;  %p846_p7 = scmp.lt.s32.totalorder %s840_s14, %s840_s14 }
  0x12   :  { %p847_p8 = por %p846_p7, %p845_p6 }
  0x14   :  { %p848_p9 = pnand %p847_p8, %p841_p5 }
  0x16   :  { %851 = shalt.err (!%p848_p9)
}
  0x17   :  { %66 = dma.hbm_to_vmem [thread:$0]  %s1131_s5, 2048, %s61_s30, [#allocation10], %s942_s10, %s942_s10, %s943_s11  }
  0x18   :  { %s944_s17 = smov [#allocation3]   ;;  %s945_s19 = smov [#allocation8]  }
  0x19   :  { %s26_s18 = sshll.u32 %s944_s17, 4  ;;  %s51_s20 = sshll.u32 %s945_s19, 4  ;;  %s27_s18 = int_to_ptr.vmem [resolvable:$true] %s26_s18  ;;  %s52_s20 = int_to_ptr.vmem [resolvable:$true] %s51_s20 }
  0x1a   :  { %s860_s3 = scalar_lea.vmem %s27_s18, 1024  ;;  %p865_p11 = scmp.lt.s32.totalorder %s27_s18, %s27_s18 }
  0x1b   :  { %p861_p10 = scmp.ne.s32.totalorder %s27_s18, %s860_s3  ;;  %p866_p12 = scmp.lt.s32.totalorder %s860_s3, %s860_s3 }
  0x1d   :  { %p867_p13 = por %p866_p12, %p865_p11 }
  0x1f   :  { %p868_p0 = pnand %p867_p13, %p861_p10 }
  0x21   :  { %871 = shalt.err (!%p868_p0)
}
  0x22   :  { %32 = dma.hbm_to_vmem [thread:$0]  %s1128_s2, 1024, %s27_s18, [#allocation4], %s942_s10, %s942_s10, %s943_s11  }
  0x23   :  { %s880_s5 = scalar_lea.vmem %s52_s20, 64  ;;  %p885_p2 = scmp.lt.s32.totalorder %s52_s20, %s52_s20 }
  0x24   :  { %p881_p1 = scmp.ne.s32.totalorder %s52_s20, %s880_s5  ;;  %p886_p3 = scmp.lt.s32.totalorder %s880_s5, %s880_s5 }
  0x26   :  { %p887_p4 = por %p886_p3, %p885_p2 }
  0x28   :  { %p888_p5 = pnand %p887_p4, %p881_p1 }
  0x2a   :  { %891 = shalt.err (!%p888_p5)
}
  0x2b   :  { %54 = dma.hbm_to_vmem [thread:$0]  %s1130_s4, 64, %s52_s20, [#allocation7]  }
  0x2c   :  { %s946_s25 = smov [#allocation11]  }
  0x2d   :  { %s72_s26 = sshll.u32 %s946_s25, 4  ;;  %s73_s26 = int_to_ptr.vmem [resolvable:$true] %s72_s26 }
  0x2e   :  { %s900_s27 = scalar_lea.vmem %s73_s26, 2048  ;;  %p905_p7 = scmp.lt.s32.totalorder %s73_s26, %s73_s26 }
  0x2f   :  { %p901_p6 = scmp.ne.s32.totalorder %s73_s26, %s900_s27  ;;  %p906_p8 = scmp.lt.s32.totalorder %s900_s27, %s900_s27 }
  0x31   :  { %p907_p9 = por %p906_p8, %p905_p7 }
  0x33   :  { %p908_p10 = pnand %p907_p9, %p901_p6 }
  0x35   :  { %911 = shalt.err (!%p908_p10)
}
  0x36   :  { %78 = dma.hbm_to_vmem [thread:$0]  %s1132_s6, 2048, %s73_s26, [#allocation10], %s942_s10, %s942_s10, %s943_s11  }
  0x37   :  { %932 = dma.done.wait [#allocation4], 1024  }
  0x38   :  { %933 = vsyncadd [#allocation4], 4294966272 }
  0x39   :  { %934 = dma.done.wait [#allocation7], 2112  }
  0x3a   :  { %935 = vsyncadd [#allocation7], 4294965184 }
  0x3b   :  { %936 = dma.done.wait [#allocation10], 4096  }
  0x3c   :  { %937 = vsyncadd [#allocation10], 4294963200  ;;  %v947_v0 = vmov 0.0   ;;  %vm948_vm0 = vmmov 0   ;;  %v110_v1 = vld [vmem:[#allocation3 + $0x38] sm:$0xff]  ;;  %v109_v2 = vld [vmem:[#allocation3 + $0x30] sm:$0xff] }
  0x3d   :  { %669 = vmatprep.subr.mxu0 %v947_v0  ;;  %685 = vmatprep.mubr.msk.f32.mxu0 %vm948_vm0, %v947_v0  ;;  %v108_v3 = vld [vmem:[#allocation3 + $0x28] sm:$0xff]  ;;  %v107_v4 = vld [vmem:[#allocation3 + $0x20] sm:$0xff]  ;;  %v106_v5 = vld [vmem:[#allocation3 + $0x18] sm:$0xff]  ;;  %vm111_vm1 = vcmask 523264   ;;  %vm246_vm2 = vcmask 1043456   ;;  %vm242_vm3 = vcmask 31744  }
  0x3e   :  { %693 = vmatprep.subr.mxu1 %v947_v0  ;;  %725 = vmatprep.mubr.msk.f32.mxu1 %vm948_vm0, %v947_v0  ;;  %v105_v6 = vld [vmem:[#allocation3 + $0x10] sm:$0xff]  ;;  %v104_v7 = vld [vmem:[#allocation3 + $0x8] sm:$0xff]  ;;  %v103_v8 = vld [vmem:[#allocation3] sm:$0xff]  ;;  %s949_s19 = smov [#allocation12]  }
  0x3f   :  { %670 = vmatpush3.msra.mxu0 %v110_v1  ;;  %v101_v9 = vld [vmem:[%s1126_s0] sm:$0xff]  ;;  %v239_v18 = vld [vmem:[#allocation6 + $0x78] sm:$0xff]  ;;  %v238_v19 = vld [vmem:[#allocation6 + $0x70] sm:$0xff]  ;;  %s587_s20 = sshll.u32 %s949_s19, 4  ;;  %s588_s20 = int_to_ptr.vmem [resolvable:$true] %s587_s20 }
  0x40   :  { %671 = vmatprep.subr.mxu0 %v947_v0  ;;  %v599_v10 = vld [vmem:[%s1133_s7] ss:$0 sm:$0xff]  ;;  %694 = vmatpush3.msra.mxu1 %v239_v18  ;;  %v237_v20 = vld [vmem:[#allocation6 + $0x68] sm:$0xff]  ;;  %v235_v22 = vld [vmem:[#allocation6 + $0x58] sm:$0xff]  ;;  %s912_s3 = scalar_lea.vmem %s588_s20, 128  ;;  %p917_p12 = scmp.lt.s32.totalorder %s588_s20, %s588_s20 }
  0x41   :  { %672 = vmatpush3.msra.mxu0 %v109_v2  ;;  %695 = vmatprep.subr.mxu1 %v947_v0  ;;  %v236_v21 = vld [vmem:[#allocation6 + $0x60] sm:$0xff]  ;;  %v234_v23 = vld [vmem:[#allocation6 + $0x50] sm:$0xff]  ;;  %v233_v24 = vld [vmem:[#allocation6 + $0x48] sm:$0xff]  ;;  %p913_p11 = scmp.ne.s32.totalorder %s588_s20, %s912_s3  ;;  %p918_p13 = scmp.lt.s32.totalorder %s912_s3, %s912_s3 }
  0x42   :  { %673 = vmatprep.subr.mxu0 %v947_v0  ;;  %696 = vmatpush3.msra.mxu1 %v238_v19  ;;  %v232_v25 = vld [vmem:[#allocation6 + $0x40] sm:$0xff]  ;;  %v231_v26 = vld [vmem:[#allocation6 + $0x38] sm:$0xff]  ;;  %v230_v27 = vld [vmem:[#allocation6 + $0x30] sm:$0xff] }
  0x43   :  { %674 = vmatpush3.msra.mxu0 %v108_v3  ;;  %697 = vmatprep.subr.mxu1 %v947_v0  ;;  %v229_v28 = vld [vmem:[#allocation6 + $0x28] sm:$0xff]  ;;  %v241_v29 = vld [vmem:[#allocation8] sm:$0xf]  ;;  %v227_v32 = vld [vmem:[#allocation6 + $0x18] sm:$0xff]  ;;  %p919_p0 = por %p918_p13, %p917_p12 }
  0x44   :  { %675 = vmatprep.subr.mxu0 %v947_v0  ;;  %698 = vmatpush3.msra.mxu1 %v237_v20  ;;  %v228_v30 = vld [vmem:[#allocation6 + $0x20] sm:$0xff]  ;;  %v226_v33 = vld [vmem:[#allocation6 + $0x10] sm:$0xff]  ;;  %v225_v34 = vld [vmem:[#allocation6 + $0x8] sm:$0xff] }
  0x45   :  { %676 = vmatpush3.msra.mxu0 %v107_v4  ;;  %699 = vmatprep.subr.mxu1 %v947_v0  ;;  %v240_v31 = vld [vmem:[%s1127_s1] sm:$0xff]  ;;  %v411_v37 = vld [vmem:[#allocation9 + $0x70] sm:$0xff]  ;;  %v410_v38 = vld [vmem:[#allocation9 + $0x68] sm:$0xff]  ;;  %p920_p1 = pnand %p919_p0, %p913_p11 }
  0x46   :  { %677 = vmatprep.subr.mxu0 %v947_v0  ;;  %700 = vmatpush3.msra.mxu1 %v236_v21  ;;  %v224_v35 = vld [vmem:[#allocation6] sm:$0xff]  ;;  %v407_v41 = vld [vmem:[#allocation9 + $0x50] sm:$0xff]  ;;  %v406_v42 = vld [vmem:[#allocation9 + $0x48] sm:$0xff] }
  0x47   :  { %678 = vmatpush3.msra.mxu0 %v106_v5  ;;  %701 = vmatprep.subr.mxu1 %v947_v0  ;;  %v412_v36 = vld [vmem:[#allocation9 + $0x78] sm:$0xff]  ;;  %v409_v39 = vld [vmem:[#allocation9 + $0x60] sm:$0xff]  ;;  %v403_v45 = vld [vmem:[#allocation9 + $0x30] sm:$0xff] }
  0x48   :  { %679 = vmatprep.subr.mxu0 %v947_v0  ;;  %702 = vmatpush3.msra.mxu1 %v235_v22  ;;  %v408_v40 = vld [vmem:[#allocation9 + $0x58] sm:$0xff]  ;;  %v405_v43 = vld [vmem:[#allocation9 + $0x40] sm:$0xff]  ;;  %v402_v46 = vld [vmem:[#allocation9 + $0x28] sm:$0xff] }
  0x49   :  { %680 = vmatpush3.msra.mxu0 %v105_v6  ;;  %703 = vmatprep.subr.mxu1 %v947_v0  ;;  %v404_v44 = vld [vmem:[#allocation9 + $0x38] sm:$0xff]  ;;  %v401_v47 = vld [vmem:[#allocation9 + $0x20] sm:$0xff]  ;;  %v399_v1 = vld [vmem:[#allocation9 + $0x10] sm:$0xff] }
  0x4a   :  { %681 = vmatprep.subr.mxu0 %v947_v0  ;;  %704 = vmatpush3.msra.mxu1 %v234_v23  ;;  %v600_v55 = vld [vmem:[%s1133_s7 + $0x1] ss:$0 sm:$0xff]  ;;  %v601_v57 = vld [vmem:[%s1133_s7 + $0x2] ss:$0 sm:$0xff]  ;;  %v398_v2 = vld [vmem:[#allocation9 + $0x8] sm:$0xff] }
  0x4b   :  { %682 = vmatpush3.msra.mxu0 %v104_v7  ;;  %705 = vmatprep.subr.mxu1 %v947_v0  ;;  %v400_v63 = vld [vmem:[#allocation9 + $0x18] sm:$0xff]  ;;  %v397_v3 = vld [vmem:[#allocation9] sm:$0xff]  ;;  %v503_v5 = vld [vmem:[#allocation11 + $0x70] sm:$0xff] }
  0x4c   :  { %683 = vmatprep.subr.mxu0 %v947_v0  ;;  %706 = vmatpush3.msra.mxu1 %v233_v24  ;;  %v504_v4 = vld [vmem:[#allocation11 + $0x78] sm:$0xff]  ;;  %v502_v6 = vld [vmem:[#allocation11 + $0x68] sm:$0xff]  ;;  %v501_v7 = vld [vmem:[#allocation11 + $0x60] sm:$0xff] }
  0x4d   :  { %684 = vmatpush3.msra.mxu0 %v103_v8  ;;  %707 = vmatprep.subr.mxu1 %v947_v0  ;;  %v500_v8 = vld [vmem:[#allocation11 + $0x58] sm:$0xff]  ;;  %v491_v23 = vld [vmem:[#allocation11 + $0x10] sm:$0xff]  ;;  %v490_v24 = vld [vmem:[#allocation11 + $0x8] sm:$0xff] }
  0x4e   :  { %686 = vmatmul.mubr.msk.f32.vlgmr.msra.gmra.mxu0 %vm111_vm1, %v101_v9  ;;  %688 = vmatprep.subr.mxu0 %v947_v0  ;;  %v499_v9 = vld [vmem:[#allocation11 + $0x50] sm:$0xff]  ;;  %v604_v18 = vld [vmem:[%s1133_s7 + $0x3] ss:$0 sm:$0xff] }
  0x4f   :  { %690 = vmatprep.mubr.msk.f32.mxu0 %vm948_vm0, %v947_v0  ;;  %708 = vmatpush3.msra.mxu1 %v232_v25  ;;  %v489_v25 = vld [vmem:[#allocation11] sm:$0xff] }
  0x50   :  { %709 = vmatprep.subr.mxu1 %v947_v0  ;;  %689 = vmatpush3.msk.msra.mxu0 %vm246_vm2, %v241_v29 }
  0x51   :  { %710 = vmatpush3.msra.mxu1 %v231_v26  ;;  %728 = vmatprep.subr.mxu0 %v947_v0  ;;  %v605_v26 = vld [vmem:[%s1133_s7 + $0x4] ss:$0 sm:$0xff] }
  0x52   :  { %711 = vmatprep.subr.mxu1 %v947_v0  ;;  %691 = vmatmul.mubr.msk.f32.vlgmr.msra.gmra.mxu0 %vm242_vm3, %v240_v31  ;;  %v606_v31 = vld [vmem:[%s1133_s7 + $0x5] ss:$0 sm:$0xff] }
  0x53   :  { %712 = vmatpush3.msra.mxu1 %v230_v27  ;;  %760 = vmatprep.mubr.msk.f32.mxu0 %vm948_vm0, %v947_v0 }
  0x54   :  { %713 = vmatprep.subr.mxu1 %v947_v0  ;;  %729 = vmatpush3.msra.mxu0 %v412_v36 }
  0x55   :  { %714 = vmatpush3.msra.mxu1 %v229_v28  ;;  %730 = vmatprep.subr.mxu0 %v947_v0 }
  0x56   :  { %715 = vmatprep.subr.mxu1 %v947_v0  ;;  %731 = vmatpush3.msra.mxu0 %v411_v37 }
  0x57   :  { %716 = vmatpush3.msra.mxu1 %v228_v30  ;;  %732 = vmatprep.subr.mxu0 %v947_v0 }
  0x58   :  { %717 = vmatprep.subr.mxu1 %v947_v0  ;;  %733 = vmatpush3.msra.mxu0 %v410_v38 }
  0x59   :  { %718 = vmatpush3.msra.mxu1 %v227_v32  ;;  %734 = vmatprep.subr.mxu0 %v947_v0 }
  0x5a   :  { %719 = vmatprep.subr.mxu1 %v947_v0  ;;  %735 = vmatpush3.msra.mxu0 %v409_v39 }
  0x5b   :  { %720 = vmatpush3.msra.mxu1 %v226_v33  ;;  %736 = vmatprep.subr.mxu0 %v947_v0 }
  0x5c   :  { %721 = vmatprep.subr.mxu1 %v947_v0  ;;  %737 = vmatpush3.msra.mxu0 %v408_v40 }
  0x5d   :  { %722 = vmatpush3.msra.mxu1 %v225_v34  ;;  %738 = vmatprep.subr.mxu0 %v947_v0 }
  0x5e   :  { %723 = vmatprep.subr.mxu1 %v947_v0  ;;  %739 = vmatpush3.msra.mxu0 %v407_v41 }
  0x5f   :  { %724 = vmatpush3.msra.mxu1 %v224_v35  ;;  %740 = vmatprep.subr.mxu0 %v947_v0 }
  0x60   :  { %763 = vmatprep.subr.mxu1 %v947_v0  ;;  %741 = vmatpush3.msra.mxu0 %v406_v42 }
  0x61   :  { %742 = vmatprep.subr.mxu0 %v947_v0 }
  0x62   :  { %743 = vmatpush3.msra.mxu0 %v405_v43 }
  0x63   :  { %744 = vmatprep.subr.mxu0 %v947_v0 }
  0x64   :  { %745 = vmatpush3.msra.mxu0 %v404_v44 }
  0x65   :  { %746 = vmatprep.subr.mxu0 %v947_v0 }
  0x66   :  { %747 = vmatpush3.msra.mxu0 %v403_v45 }
  0x67   :  { %748 = vmatprep.subr.mxu0 %v947_v0 }
  0x68   :  { %749 = vmatpush3.msra.mxu0 %v402_v46 }
  0x69   :  { %750 = vmatprep.subr.mxu0 %v947_v0 }
  0x6a   :  { %751 = vmatpush3.msra.mxu0 %v401_v47 }
  0x6b   :  { %752 = vmatprep.subr.mxu0 %v947_v0 }
  0x6c   :  { %753 = vmatpush3.msra.mxu0 %v400_v63 }
  0x6d   :  { %754 = vmatprep.subr.mxu0 %v947_v0 }
  0x6e   :  { %755 = vmatpush3.msra.mxu0 %v399_v1 }
  0x6f   :  { %756 = vmatprep.subr.mxu0 %v947_v0 }
  0x70   :  { %757 = vmatpush3.msra.mxu0 %v398_v2 }
  0x71   :  { %758 = vmatprep.subr.mxu0 %v947_v0 }
  0x72   :  { %759 = vmatpush3.msra.mxu0 %v397_v3 }
 0x10e   :  { %v181_v11 = vpop.f32.mrf.mxu0 }
 0x10f   :  { %v196_v12 = vadd.f32 %v599_v10, %v181_v11  ;;  %v498_v10 = vld [vmem:[#allocation11 + $0x48] sm:$0xff]  ;;  %v497_v11 = vld [vmem:[#allocation11 + $0x40] sm:$0xff] }
 0x110   :  { %v687_v13 = vpop.f32.mrf.mxu0 }
 0x111   :  { %197 = vadd.xlane.f32.xlu0 %v196_v12  ;;  %v495_v13 = vld [vmem:[#allocation11 + $0x30] sm:$0xff] }
 0x112   :  { %v316_v61 = vpop.f32.mrf.mxu0 }
 0x114   :  { %v692_v62 = vpop.f32.mrf.mxu0 }
 0x19a   :  { %v198_v14 = vpop.xlane.xlu0 %197 }
 0x19b   :  { %v1044_v15 = vmul.f32 0.03125, %v198_v14  ;;  %v494_v14 = vld [vmem:[#allocation11 + $0x28] sm:$0xff] }
 0x19d   :  { %v1047_v16 = vsub.f32 %v196_v12, %v1044_v15  ;;  %v204_v48 = vmul.f32 %v1044_v15, %v1044_v15  ;;  %v496_v12 = vld [vmem:[#allocation11 + $0x38] sm:$0xff]  ;;  %v493_v15 = vld [vmem:[#allocation11 + $0x20] sm:$0xff] }
 0x19f   :  { %v201_v17 = vmul.f32 %v1047_v16, %v1047_v16  ;;  %v205_v49 = vmul.f32 96.0, %v204_v48 }
 0x1a1   :  { %202 = vadd.xlane.f32.xlu0 %v201_v17 }
 0x22a   :  { %v203_v50 = vpop.xlane.xlu0 %202 }
 0x22b   :  { %v206_v51 = vsub.f32 %v203_v50, %v205_v49 }
 0x22d   :  { %v207_v52 = vmul.f32 0.03125, %v206_v51 }
 0x22f   :  { %v208_v53 = vadd.f32 1e-05, %v207_v52 }
 0x231   :  { %808 = vrsqrt.f32 %v208_v53 }
 0x23e   :  { %v809_v54 = vpop.eup %808 }
 0x23f   :  { %v210_v56 = vmul.f32 %v809_v54, %v1047_v16  ;;  %v492_v16 = vld [vmem:[#allocation11 + $0x18] sm:$0xff] }
 0x241   :  { %v216_v58 = vmul.f32 %v600_v55, %v210_v56 }
 0x243   :  { %v222_v59 = vadd.f32 %v601_v57, %v216_v58 }
 0x245   :  { %810 = vtanh.f32 %v222_v59 }
 0x252   :  { %v811_v60 = vpop.eup %810 }
 0x253   :  { %726 = vmatmul.mubr.f32.vlgmr.msra.gmra.mxu1 %v811_v60 }
 0x254   :  { %795 = vmatprep.mubr.msk.f32.mxu1 %vm948_vm0, %v947_v0  ;;  %764 = vmatpush3.msra.mxu1 %v504_v4 }
 0x255   :  { %765 = vmatprep.subr.mxu1 %v947_v0 }
 0x256   :  { %766 = vmatpush3.msra.mxu1 %v503_v5 }
 0x257   :  { %767 = vmatprep.subr.mxu1 %v947_v0 }
 0x258   :  { %768 = vmatpush3.msra.mxu1 %v502_v6 }
 0x259   :  { %769 = vmatprep.subr.mxu1 %v947_v0 }
 0x25a   :  { %770 = vmatpush3.msra.mxu1 %v501_v7 }
 0x25b   :  { %771 = vmatprep.subr.mxu1 %v947_v0 }
 0x25c   :  { %772 = vmatpush3.msra.mxu1 %v500_v8 }
 0x25d   :  { %773 = vmatprep.subr.mxu1 %v947_v0 }
 0x25e   :  { %774 = vmatpush3.msra.mxu1 %v499_v9 }
 0x25f   :  { %775 = vmatprep.subr.mxu1 %v947_v0 }
 0x260   :  { %776 = vmatpush3.msra.mxu1 %v498_v10 }
 0x261   :  { %777 = vmatprep.subr.mxu1 %v947_v0 }
 0x262   :  { %778 = vmatpush3.msra.mxu1 %v497_v11 }
 0x263   :  { %779 = vmatprep.subr.mxu1 %v947_v0 }
 0x264   :  { %780 = vmatpush3.msra.mxu1 %v496_v12 }
 0x265   :  { %781 = vmatprep.subr.mxu1 %v947_v0 }
 0x266   :  { %782 = vmatpush3.msra.mxu1 %v495_v13 }
 0x267   :  { %783 = vmatprep.subr.mxu1 %v947_v0 }
 0x268   :  { %784 = vmatpush3.msra.mxu1 %v494_v14 }
 0x269   :  { %785 = vmatprep.subr.mxu1 %v947_v0 }
 0x26a   :  { %786 = vmatpush3.msra.mxu1 %v493_v15 }
 0x26b   :  { %787 = vmatprep.subr.mxu1 %v947_v0 }
 0x26c   :  { %788 = vmatpush3.msra.mxu1 %v492_v16 }
 0x26d   :  { %789 = vmatprep.subr.mxu1 %v947_v0 }
 0x26e   :  { %790 = vmatpush3.msra.mxu1 %v491_v23 }
 0x26f   :  { %791 = vmatprep.subr.mxu1 %v947_v0 }
 0x270   :  { %792 = vmatpush3.msra.mxu1 %v490_v24 }
 0x271   :  { %793 = vmatprep.subr.mxu1 %v947_v0 }
 0x272   :  { %794 = vmatpush3.msra.mxu1 %v489_v25 }
 0x313   :  { %v386_v17 = vpop.f32.mrf.mxu1 }
 0x314   :  { %v387_v19 = vadd.f32 %v386_v17, %v316_v61 }
 0x315   :  { %v727_v20 = vpop.f32.mrf.mxu1 }
 0x316   :  { %v395_v21 = vadd.f32 %v604_v18, %v387_v19 }
 0x318   :  { %v396_v22 = vmax.f32 %v395_v21, 0.0 }
 0x31a   :  { %761 = vmatmul.mubr.f32.vlgmr.msra.gmra.mxu0 %v396_v22 }
 0x3da   :  { %v484_v27 = vpop.f32.mrf.mxu0 }
 0x3db   :  { %v485_v28 = vadd.f32 %v605_v26, %v484_v27 }
 0x3dc   :  { %v762_v29 = vpop.f32.mrf.mxu0 }
 0x3dd   :  { %v488_v30 = vmax.f32 %v485_v28, 0.0 }
 0x3df   :  { %796 = vmatmul.mubr.f32.vlgmr.msra.gmra.mxu1 %v488_v30 }
 0x49f   :  { %v576_v32 = vpop.f32.mrf.mxu1 }
 0x4a0   :  { %v577_v33 = vadd.f32 %v606_v31, %v576_v32 }
 0x4a1   :  { %v797_v0 = vpop.f32.mrf.mxu1 }
 0x4a2   :  { %580 = vst [vmem:[#allocation12] sm:$0xff] %v577_v33 }
 0x4a3   :  { %923 = shalt.err (!%p920_p1)
}
 0x4a4   :  { %590 = dma.vmem_to_hbm [thread:$0]  %s588_s20, 128, %s1134_s8, [#allocation5]  }
 0x4a5   :  { %938 = dma.done.wait [#allocation5], 128  }
 0x4a6   :  { %939 = vsyncadd [#allocation5], 4294967168 }
 0x4a7   :  { %594 = vsyncpa [#allocation4], 1 }
 0x4a8   :  { %595 = vsyncpa [#allocation7], 1 }
 0x4a9   :  { %596 = vsyncpa [#allocation10], 1 }
 0x4aa   :  { %597 = vsyncpa [#allocation5], 1 }

</bundles_post_ra>
